<compile_context>
chip_gen: v6e
topology: v6e:2x2x1
jax: 0.10.0
libtpu: 0.0.40
codegen_flags: <defaults>
</compile_context>

<pallas_src>
import jax
import jax.numpy as jnp
from jax.experimental import pallas as pl
from jax.experimental.pallas import tpu as pltpu

IN_FEATURES = 2048
OUT_FEATURES = 512


def linear_kernel(x_ref, w_ref, b_ref, o_ref):
    """One grid step (over N tiles): y_tile = x @ w_tile + b_tile."""
    acc = jnp.dot(x_ref[...], w_ref[...], preferred_element_type=jnp.float32)
    o_ref[...] = (acc + b_ref[...]).astype(o_ref.dtype)


def _default_tn(n):
    """Pick the N tile: split across the two TensorCores on v7x, else one tile."""
    try:
        kind = jax.devices()[0].device_kind.lower()
    except Exception:
        kind = ""
    if "v7" in kind and n % 256 == 0 and n // 256 >= 2:
        return 256
    return n


def linear_pallas(x, w_t, b, *, tn=None):
    """y = x @ w_t + b with x:(M,K), w_t:(K,N), b:(N,). Output is float32."""
    M, K = x.shape
    Kw, N = w_t.shape
    assert K == Kw and b.shape == (N,)
    if tn is None:
        tn = _default_tn(N)
    assert N % tn == 0

    b2d = b.reshape(1, N).astype(jnp.float32)  # keep bias 2-D (lanes on last dim)

    return pl.pallas_call(
        linear_kernel,
        out_shape=jax.ShapeDtypeStruct((M, N), jnp.float32),
        grid_spec=pltpu.PrefetchScalarGridSpec(
            num_scalar_prefetch=0,
            grid=(N // tn,),
            in_specs=[
                pl.BlockSpec((M, K), lambda n: (0, 0)),    # x: fetched once
                pl.BlockSpec((K, tn), lambda n: (0, n)),   # weight column tile
                pl.BlockSpec((1, tn), lambda n: (0, n)),   # bias tile
            ],
            out_specs=pl.BlockSpec((M, tn), lambda n: (0, n)),
        ),
        compiler_params=pltpu.CompilerParams(
            dimension_semantics=("parallel",),
        ),
    )(x, w_t, b2d)


def init_params(key):
    """Deterministic params matching Converter1.__init__ shapes/init."""
    kw, kb = jax.random.split(key)
    # kaiming_normal_(weight, mode='fan_out', nonlinearity='relu'):
    # std = sqrt(2 / fan_out) with fan_out = OUT_FEATURES.
    std = (2.0 / OUT_FEATURES) ** 0.5
    w = jax.random.normal(kw, (OUT_FEATURES, IN_FEATURES), jnp.float32) * std
    # nn.Linear default bias init: U(-1/sqrt(fan_in), 1/sqrt(fan_in)).
    bound = 1.0 / (IN_FEATURES ** 0.5)
    b = jax.random.uniform(
        kb, (OUT_FEATURES,), jnp.float32, minval=-bound, maxval=bound
    )
    return w, b


if __name__ == "__main__":
    key = jax.random.PRNGKey(0)
    k_x, k_p = jax.random.split(key)

    batch = 8  # small batch; feature dims fixed by the module (2048 -> 512)
    x = jax.random.normal(k_x, (batch, IN_FEATURES), jnp.float32)
    w, b = init_params(k_p)

    # bf16 compute path: halves HBM bytes for the (dominant) weight traffic.
    w_t_bf16 = jnp.transpose(w).astype(jnp.bfloat16)  # (K, N)
    x_bf16 = x.astype(jnp.bfloat16)

    y = linear_pallas(x_bf16, w_t_bf16, b)
    y = jax.block_until_ready(y)
    assert y.shape == (batch, OUT_FEATURES)

    # Tight check vs a reference that uses the same bf16-rounded inputs.
    x_r = x_bf16.astype(jnp.float32)
    w_r = w.astype(jnp.bfloat16).astype(jnp.float32)
    y_ref_bf16 = x_r @ w_r.T + b
    assert jnp.allclose(y, y_ref_bf16, atol=1e-3, rtol=1e-3)

    # Loose sanity check vs the exact f32 PyTorch-equivalent forward.
    y_ref_f32 = x @ w.T + b
    assert jnp.allclose(y, y_ref_f32, atol=3e-2, rtol=3e-2)

    print("KERNEL_OK")
</pallas_src>

<mosaic_0001>
module attributes {stable_mosaic.version = 11 : i64} {
  func.func @linear_kernel(%arg0: i32, %arg1: memref<8x2048xbf16, #tpu.memory_space<vmem>>, %arg2: memref<2048x512xbf16, #tpu.memory_space<vmem>>, %arg3: memref<1x512xf32, #tpu.memory_space<vmem>>, %arg4: memref<8x512xf32, #tpu.memory_space<vmem>>) attributes {dimension_semantics = [#tpu.dimension_semantics<parallel>], iteration_bounds = array<i64: 1>, scalar_prefetch = 0 : i64, scratch_operands = 0 : i64, tpu.core_type = #tpu.core_type<tc>, window_params = [{pipeline_mode = #tpu.pipeline_mode<synchronous>, transform_indices = @transform_0, window_bounds = array<i64: 8, 2048>}, {transform_indices = @transform_1, window_bounds = array<i64: 2048, 512>}, {transform_indices = @transform_2, window_bounds = array<i64: 1, 512>}, {transform_indices = @transform_3, window_bounds = array<i64: 8, 512>}]} {
    %c0 = arith.constant 0 : index
    %c0_0 = arith.constant 0 : index
    %0 = vector.load %arg1[%c0, %c0_0] : memref<8x2048xbf16, #tpu.memory_space<vmem>>, vector<8x2048xbf16>
    %c0_1 = arith.constant 0 : index
    %c0_2 = arith.constant 0 : index
    %1 = vector.load %arg2[%c0_1, %c0_2] : memref<2048x512xbf16, #tpu.memory_space<vmem>>, vector<2048x512xbf16>
    %cst = arith.constant dense<0.000000e+00> : vector<8x512xf32>
    %2 = tpu.matmul %0, %1, %cst {dimension_numbers = #tpu.dot_dimension_numbers<[1], [0], [0], [1], [0, 0, 1, 1], [], []>} : vector<8x2048xbf16>, vector<2048x512xbf16>, vector<8x512xf32> -> vector<8x512xf32>
    %c0_3 = arith.constant 0 : index
    %c0_4 = arith.constant 0 : index
    %3 = vector.load %arg3[%c0_3, %c0_4] : memref<1x512xf32, #tpu.memory_space<vmem>>, vector<1x512xf32>
    %4 = vector.broadcast %3 : vector<1x512xf32> to vector<8x512xf32>
    %5 = arith.addf %2, %4 : vector<8x512xf32>
    %c0_5 = arith.constant 0 : index
    %c0_6 = arith.constant 0 : index
    %6 = vector.load %arg4[%c0_5, %c0_6] : memref<8x512xf32, #tpu.memory_space<vmem>>, vector<8x512xf32>
    tpu.vector_store %arg4[%c0_5, %c0_6], %5 {strides = array<i32>} : memref<8x512xf32, #tpu.memory_space<vmem>>, vector<8x512xf32>,
    return
  }
  func.func @transform_0(%arg0: i32) -> (i32, i32) {
    %c0_i32 = arith.constant 0 : i32
    %c0_i32_0 = arith.constant 0 : i32
    %c0_i32_1 = arith.constant 0 : i32
    return %c0_i32, %c0_i32_0 : i32, i32
  }
  func.func @transform_1(%arg0: i32) -> (i32, i32) {
    %c0_i32 = arith.constant 0 : i32
    %c0_i32_0 = arith.constant 0 : i32
    return %c0_i32, %arg0 : i32, i32
  }
  func.func @transform_2(%arg0: i32) -> (i32, i32) {
    %c0_i32 = arith.constant 0 : i32
    %c0_i32_0 = arith.constant 0 : i32
    return %c0_i32, %arg0 : i32, i32
  }
  func.func @transform_3(%arg0: i32) -> (i32, i32) {
    %c0_i32 = arith.constant 0 : i32
    %c0_i32_0 = arith.constant 0 : i32
    return %c0_i32, %arg0 : i32, i32
  }
}

</mosaic_0001>

<bundles_post_ra>
// kernel: tpu_custom_call.1
= control target key start
LH: loop header
LB: loop body
LE: loop exit
PB: predicated region body
PF: predicated region fallthrough
CT: control target
= control target key end

     0   :  { %8 = vsyncpa [#allocation3], 0  ;;  %s5459_s0 = inlined_call_operand.hbm [shape: bf16[8,2048], index: 0, kind: input, shape index: {}]   ;;  %s5460_s1 = inlined_call_operand.hbm [shape: bf16[2048,512], index: 1, kind: input, shape index: {}]   ;;  %s5461_s2 = inlined_call_operand.hbm [shape: f32[1,512], index: 2, kind: input, shape index: {}]   ;;  %s5462_s3 = inlined_call_operand.hbm [shape: f32[8,512], index: 3, kind: output, shape index: {}]  }
   0x1   :  { %9 = vsyncpa [#allocation6], 0 }
   0x2   :  { %10 = vsyncpa [#allocation4], 0  ;;  %s5291_s12 = smov [#allocation5]  }
   0x3   :  { %s26_s13 = sshll.u32 %s5291_s12, 4  ;;  %s27_s13 = int_to_ptr.vmem [resolvable:$true] %s26_s13 }
   0x4   :  { %s5213_s14 = scalar_lea.vmem %s27_s13, 65536  ;;  %p5218_p1 = scmp.lt.s32.totalorder %s27_s13, %s27_s13 }
   0x5   :  { %p5214_p0 = scmp.ne.s32.totalorder %s27_s13, %s5213_s14  ;;  %p5219_p2 = scmp.lt.s32.totalorder %s5213_s14, %s5213_s14 }
   0x7   :  { %p5220_p3 = por %p5219_p2, %p5218_p1 }
   0x9   :  { %p5221_p4 = pnand %p5220_p3, %p5214_p0 }
   0xb   :  { %5224 = shalt.err (!%p5221_p4)
}
   0xc   :  { %s5292_s15 = smov 256   ;;  %s5293_s16 = smov 16  }
   0xd   :  { %32 = dma.hbm_to_vmem [thread:$0]  %s5460_s1, 65536, %s27_s13, [#allocation6], %s5292_s15, %s5292_s15, %s5293_s16  }
   0xe   :  { %s5294_s19 = smov [#allocation2]   ;;  %s5295_s21 = smov [#allocation7]  }
   0xf   :  { %s17_s20 = sshll.u32 %s5294_s19, 4  ;;  %s39_s22 = sshll.u32 %s5295_s21, 4  ;;  %s18_s20 = int_to_ptr.vmem [resolvable:$true] %s17_s20  ;;  %s40_s22 = int_to_ptr.vmem [resolvable:$true] %s39_s22 }
  0x10   :  { %s5233_s23 = scalar_lea.vmem %s18_s20, 1024  ;;  %p5238_p6 = scmp.lt.s32.totalorder %s18_s20, %s18_s20 }
  0x11   :  { %p5234_p5 = scmp.ne.s32.totalorder %s18_s20, %s5233_s23  ;;  %p5239_p7 = scmp.lt.s32.totalorder %s5233_s23, %s5233_s23 }
  0x13   :  { %p5240_p8 = por %p5239_p7, %p5238_p6 }
  0x15   :  { %p5241_p9 = pnand %p5240_p8, %p5234_p5 }
  0x17   :  { %5244 = shalt.err (!%p5241_p9)
}
  0x18   :  { %20 = dma.hbm_to_vmem [thread:$0]  %s5459_s0, 1024, %s18_s20, [#allocation3]  }
  0x19   :  { %s5253_s26 = scalar_lea.vmem %s40_s22, 64  ;;  %p5258_p11 = scmp.lt.s32.totalorder %s40_s22, %s40_s22 }
  0x1a   :  { %p5254_p10 = scmp.ne.s32.totalorder %s40_s22, %s5253_s26  ;;  %p5259_p12 = scmp.lt.s32.totalorder %s5253_s26, %s5253_s26 }
  0x1c   :  { %p5260_p13 = por %p5259_p12, %p5258_p11 }
  0x1e   :  { %p5261_p0 = pnand %p5260_p13, %p5254_p10 }
  0x20   :  { %5264 = shalt.err (!%p5261_p0)
}
  0x21   :  { %42 = dma.hbm_to_vmem [thread:$0]  %s5461_s2, 64, %s40_s22, [#allocation6]  }
  0x22   :  { %5285 = dma.done.wait [#allocation3], 1024  }
  0x23   :  { %5286 = vsyncadd [#allocation3], 4294966272 }
  0x24   :  { %5287 = dma.done.wait [#allocation6], 65600  }
  0x25   :  { %5288 = vsyncadd [#allocation6], 4294901696  ;;  %v4420_v0 = vld [vmem:[#allocation5 + $0xe4] ss:$16 sps:$4 sm:$0xff]   ;;  %v4424_v2 = vld [vmem:[#allocation5 + $0xe0] ss:$16 sps:$4 sm:$0xff]  }
  0x26   :  { %v4422_v1 = vld [vmem:[#allocation5 + $0x2e4] ss:$16 sps:$4 sm:$0xff]   ;;  %3210 = vmatprep.subr.bf16.mxu0 %v4420_v0  ;;  %v4425_v3 = vld [vmem:[#allocation5 + $0x2e0] ss:$16 sps:$4 sm:$0xff]   ;;  %v53_v48 = vld [vmem:[#allocation2 + $0x8] sm:$0xff]  ;;  %s5296_s0 = smov [#allocation8]  }
  0x27   :  { %3251 = vmatprep.subr.bf16.mxu1 %v4422_v1  ;;  %v4426_v4 = vld [vmem:[#allocation5 + $0xc4] ss:$16 sps:$4 sm:$0xff]   ;;  %3211 = vmatpush1.bf16.msra.mxu0 %v4424_v2  ;;  %v4430_v6 = vld [vmem:[#allocation5 + $0xc0] ss:$16 sps:$4 sm:$0xff]   ;;  %v5328_v51 = vcombine.high %v53_v48, %v53_v48  ;;  %s3876_s2 = sshll.u32 %s5296_s0, 4  ;;  %s3877_s2 = int_to_ptr.vmem [resolvable:$true] %s3876_s2 }
  0x28   :  { %3252 = vmatpush1.bf16.msra.mxu1 %v4425_v3  ;;  %v4428_v5 = vld [vmem:[#allocation5 + $0x2c4] ss:$16 sps:$4 sm:$0xff]   ;;  %3212 = vmatprep.subr.bf16.mxu0 %v4426_v4  ;;  %v4431_v7 = vld [vmem:[#allocation5 + $0x2c0] ss:$16 sps:$4 sm:$0xff]   ;;  %s5265_s28 = scalar_lea.vmem %s3877_s2, 512  ;;  %p5270_p2 = scmp.lt.s32.totalorder %s3877_s2, %s3877_s2 }
  0x29   :  { %3253 = vmatprep.subr.bf16.mxu1 %v4428_v5  ;;  %v4432_v8 = vld [vmem:[#allocation5 + $0xa4] ss:$16 sps:$4 sm:$0xff]   ;;  %v4436_v10 = vld [vmem:[#allocation5 + $0xa0] ss:$16 sps:$4 sm:$0xff]   ;;  %3283 = vmatprep.mubr.bf16.mxu1 %v5328_v51  ;;  %p5266_p1 = scmp.ne.s32.totalorder %s3877_s2, %s5265_s28  ;;  %p5271_p3 = scmp.lt.s32.totalorder %s5265_s28, %s5265_s28 }
  0x2a   :  { %v4434_v9 = vld [vmem:[#allocation5 + $0x2a4] ss:$16 sps:$4 sm:$0xff]   ;;  %v4437_v11 = vld [vmem:[#allocation5 + $0x2a0] ss:$16 sps:$4 sm:$0xff]  }
  0x2b   :  { %3213 = vmatpush1.bf16.msra.mxu0 %v4430_v6  ;;  %v4438_v12 = vld [vmem:[#allocation5 + $0x84] ss:$16 sps:$4 sm:$0xff]   ;;  %v4442_v14 = vld [vmem:[#allocation5 + $0x80] ss:$16 sps:$4 sm:$0xff]   ;;  %p5272_p4 = por %p5271_p3, %p5270_p2 }
  0x2c   :  { %3254 = vmatpush1.bf16.msra.mxu1 %v4431_v7  ;;  %3214 = vmatprep.subr.bf16.mxu0 %v4432_v8  ;;  %v4440_v13 = vld [vmem:[#allocation5 + $0x284] ss:$16 sps:$4 sm:$0xff]   ;;  %v4443_v15 = vld [vmem:[#allocation5 + $0x280] ss:$16 sps:$4 sm:$0xff]   ;;  %v5334_v7 = vcombine.low %v53_v48, %v53_v48 }
  0x2d   :  { %3255 = vmatprep.subr.bf16.mxu1 %v4434_v9  ;;  %v4444_v16 = vld [vmem:[#allocation5 + $0x64] ss:$16 sps:$4 sm:$0xff]   ;;  %v4448_v18 = vld [vmem:[#allocation5 + $0x60] ss:$16 sps:$4 sm:$0xff]   ;;  %p5273_p5 = pnand %p5272_p4, %p5266_p1 }
  0x2e   :  { %v4446_v17 = vld [vmem:[#allocation5 + $0x264] ss:$16 sps:$4 sm:$0xff]   ;;  %v4449_v19 = vld [vmem:[#allocation5 + $0x260] ss:$16 sps:$4 sm:$0xff]  }
  0x2f   :  { %3215 = vmatpush1.bf16.msra.mxu0 %v4436_v10  ;;  %v4450_v20 = vld [vmem:[#allocation5 + $0x44] ss:$16 sps:$4 sm:$0xff]   ;;  %v4454_v22 = vld [vmem:[#allocation5 + $0x40] ss:$16 sps:$4 sm:$0xff]  }
  0x30   :  { %3256 = vmatpush1.bf16.msra.mxu1 %v4437_v11  ;;  %3216 = vmatprep.subr.bf16.mxu0 %v4438_v12  ;;  %v4452_v21 = vld [vmem:[#allocation5 + $0x244] ss:$16 sps:$4 sm:$0xff]   ;;  %v4455_v23 = vld [vmem:[#allocation5 + $0x240] ss:$16 sps:$4 sm:$0xff]  }
  0x31   :  { %3257 = vmatprep.subr.bf16.mxu1 %v4440_v13  ;;  %v4456_v24 = vld [vmem:[#allocation5 + $0x24] ss:$16 sps:$4 sm:$0xff]   ;;  %v4460_v26 = vld [vmem:[#allocation5 + $0x20] ss:$16 sps:$4 sm:$0xff]  }
  0x32   :  { %v4458_v25 = vld [vmem:[#allocation5 + $0x224] ss:$16 sps:$4 sm:$0xff]   ;;  %v4461_v27 = vld [vmem:[#allocation5 + $0x220] ss:$16 sps:$4 sm:$0xff]  }
  0x33   :  { %3217 = vmatpush1.bf16.msra.mxu0 %v4442_v14  ;;  %v4462_v28 = vld [vmem:[#allocation5 + $0x4] ss:$16 sps:$4 sm:$0xff]   ;;  %v4466_v30 = vld [vmem:[#allocation5] ss:$16 sps:$4 sm:$0xff]  }
  0x34   :  { %3258 = vmatpush1.bf16.msra.mxu1 %v4443_v15  ;;  %3218 = vmatprep.subr.bf16.mxu0 %v4444_v16  ;;  %v4464_v29 = vld [vmem:[#allocation5 + $0x204] ss:$16 sps:$4 sm:$0xff]   ;;  %v4467_v31 = vld [vmem:[#allocation5 + $0x200] ss:$16 sps:$4 sm:$0xff]  }
  0x35   :  { %3259 = vmatprep.subr.bf16.mxu1 %v4446_v17  ;;  %v4468_v32 = vld [vmem:[#allocation5 + $0x1e4] ss:$16 sps:$4 sm:$0xff]   ;;  %v4472_v34 = vld [vmem:[#allocation5 + $0x1e0] ss:$16 sps:$4 sm:$0xff]  }
  0x36   :  { %v4470_v33 = vld [vmem:[#allocation5 + $0x3e4] ss:$16 sps:$4 sm:$0xff]   ;;  %v4473_v35 = vld [vmem:[#allocation5 + $0x3e0] ss:$16 sps:$4 sm:$0xff]  }
  0x37   :  { %3219 = vmatpush1.bf16.msra.mxu0 %v4448_v18  ;;  %v4474_v36 = vld [vmem:[#allocation5 + $0x1c4] ss:$16 sps:$4 sm:$0xff]   ;;  %v4478_v38 = vld [vmem:[#allocation5 + $0x1c0] ss:$16 sps:$4 sm:$0xff]  }
  0x38   :  { %3260 = vmatpush1.bf16.msra.mxu1 %v4449_v19  ;;  %3220 = vmatprep.subr.bf16.mxu0 %v4450_v20  ;;  %v4476_v37 = vld [vmem:[#allocation5 + $0x3c4] ss:$16 sps:$4 sm:$0xff]   ;;  %v4479_v39 = vld [vmem:[#allocation5 + $0x3c0] ss:$16 sps:$4 sm:$0xff]  }
  0x39   :  { %3261 = vmatprep.subr.bf16.mxu1 %v4452_v21  ;;  %v4480_v40 = vld [vmem:[#allocation5 + $0x1a4] ss:$16 sps:$4 sm:$0xff]   ;;  %v4484_v42 = vld [vmem:[#allocation5 + $0x1a0] ss:$16 sps:$4 sm:$0xff]  }
  0x3a   :  { %v4482_v41 = vld [vmem:[#allocation5 + $0x3a4] ss:$16 sps:$4 sm:$0xff]   ;;  %v4485_v43 = vld [vmem:[#allocation5 + $0x3a0] ss:$16 sps:$4 sm:$0xff]  }
  0x3b   :  { %3221 = vmatpush1.bf16.msra.mxu0 %v4454_v22  ;;  %v4486_v44 = vld [vmem:[#allocation5 + $0x184] ss:$16 sps:$4 sm:$0xff]   ;;  %v4490_v49 = vld [vmem:[#allocation5 + $0x180] ss:$16 sps:$4 sm:$0xff]  }
  0x3c   :  { %3262 = vmatpush1.bf16.msra.mxu1 %v4455_v23  ;;  %3222 = vmatprep.subr.bf16.mxu0 %v4456_v24  ;;  %v4488_v45 = vld [vmem:[#allocation5 + $0x384] ss:$16 sps:$4 sm:$0xff]   ;;  %v4491_v50 = vld [vmem:[#allocation5 + $0x380] ss:$16 sps:$4 sm:$0xff]  }
  0x3d   :  { %3263 = vmatprep.subr.bf16.mxu1 %v4458_v25  ;;  %v52_v46 = vld [vmem:[#allocation2] sm:$0xff] }
  0x3e   :  { %v5326_v47 = vcombine.high %v52_v46, %v52_v46  ;;  %v4492_v52 = vld [vmem:[#allocation5 + $0x164] ss:$16 sps:$4 sm:$0xff]   ;;  %v4496_v54 = vld [vmem:[#allocation5 + $0x160] ss:$16 sps:$4 sm:$0xff]   ;;  %v5332_v6 = vcombine.low %v52_v46, %v52_v46 }
  0x3f   :  { %3223 = vmatpush1.bf16.msra.mxu0 %v4460_v26  ;;  %v4494_v53 = vld [vmem:[#allocation5 + $0x364] ss:$16 sps:$4 sm:$0xff]   ;;  %v4497_v55 = vld [vmem:[#allocation5 + $0x360] ss:$16 sps:$4 sm:$0xff]  }
  0x40   :  { %3264 = vmatpush1.bf16.msra.mxu1 %v4461_v27  ;;  %3224 = vmatprep.subr.bf16.mxu0 %v4462_v28  ;;  %v4498_v56 = vld [vmem:[#allocation5 + $0x144] ss:$16 sps:$4 sm:$0xff]   ;;  %v4502_v58 = vld [vmem:[#allocation5 + $0x140] ss:$16 sps:$4 sm:$0xff]  }
  0x41   :  { %3265 = vmatprep.subr.bf16.mxu1 %v4464_v29  ;;  %3242 = vmatprep.mubr.bf16.mxu0 %v5326_v47  ;;  %v4500_v57 = vld [vmem:[#allocation5 + $0x344] ss:$16 sps:$4 sm:$0xff]   ;;  %v4503_v59 = vld [vmem:[#allocation5 + $0x340] ss:$16 sps:$4 sm:$0xff]  }
  0x42   :  { %v4504_v60 = vld [vmem:[#allocation5 + $0x124] ss:$16 sps:$4 sm:$0xff]   ;;  %v4508_v62 = vld [vmem:[#allocation5 + $0x120] ss:$16 sps:$4 sm:$0xff]  }
  0x43   :  { %3225 = vmatpush1.bf16.msra.mxu0 %v4466_v30  ;;  %v4506_v61 = vld [vmem:[#allocation5 + $0x324] ss:$16 sps:$4 sm:$0xff]   ;;  %v4509_v63 = vld [vmem:[#allocation5 + $0x320] ss:$16 sps:$4 sm:$0xff]  }
  0x44   :  { %3266 = vmatpush1.bf16.msra.mxu1 %v4467_v31  ;;  %3226 = vmatprep.subr.bf16.mxu0 %v4468_v32  ;;  %v4510_v0 = vld [vmem:[#allocation5 + $0x104] ss:$16 sps:$4 sm:$0xff]   ;;  %v4514_v2 = vld [vmem:[#allocation5 + $0x100] ss:$16 sps:$4 sm:$0xff]  }
  0x45   :  { %3267 = vmatprep.subr.bf16.mxu1 %v4470_v33  ;;  %v4512_v1 = vld [vmem:[#allocation5 + $0x304] ss:$16 sps:$4 sm:$0xff]   ;;  %v4515_v3 = vld [vmem:[#allocation5 + $0x300] ss:$16 sps:$4 sm:$0xff]   ;;  %v5340_v33 = vld [vmem:[#allocation2 + $0x18] sm:$0xff] }
  0x46   :  { %v4522_v4 = vld [vmem:[#allocation5 + $0x4e4] ss:$16 sps:$4 sm:$0xff]   ;;  %v4520_v8 = vld [vmem:[#allocation5 + $0x4e0] ss:$16 sps:$4 sm:$0xff]  }
  0x47   :  { %3227 = vmatpush2.bf16.msra.mxu0 %v4472_v34  ;;  %v4525_v5 = vld [vmem:[#allocation5 + $0x6e4] ss:$16 sps:$4 sm:$0xff]   ;;  %v4523_v9 = vld [vmem:[#allocation5 + $0x6e0] ss:$16 sps:$4 sm:$0xff]  }
  0x48   :  { %3268 = vmatpush2.bf16.msra.mxu1 %v4473_v35  ;;  %3228 = vmatprep.subr.bf16.mxu0 %v4474_v36  ;;  %v4528_v10 = vld [vmem:[#allocation5 + $0x4c4] ss:$16 sps:$4 sm:$0xff]   ;;  %v4526_v12 = vld [vmem:[#allocation5 + $0x4c0] ss:$16 sps:$4 sm:$0xff]  }
  0x49   :  { %3269 = vmatprep.subr.bf16.mxu1 %v4476_v37  ;;  %v4531_v11 = vld [vmem:[#allocation5 + $0x6c4] ss:$16 sps:$4 sm:$0xff]   ;;  %v4529_v13 = vld [vmem:[#allocation5 + $0x6c0] ss:$16 sps:$4 sm:$0xff]   ;;  %v5348_v37 = vcombine.high %v5340_v33, %v5340_v33 }
  0x4a   :  { %v4534_v14 = vld [vmem:[#allocation5 + $0x4a4] ss:$16 sps:$4 sm:$0xff]   ;;  %v4532_v16 = vld [vmem:[#allocation5 + $0x4a0] ss:$16 sps:$4 sm:$0xff]  }
  0x4b   :  { %3229 = vmatpush2.bf16.msra.mxu0 %v4478_v38  ;;  %v4537_v15 = vld [vmem:[#allocation5 + $0x6a4] ss:$16 sps:$4 sm:$0xff]   ;;  %v4535_v17 = vld [vmem:[#allocation5 + $0x6a0] ss:$16 sps:$4 sm:$0xff]  }
  0x4c   :  { %3270 = vmatpush2.bf16.msra.mxu1 %v4479_v39  ;;  %3230 = vmatprep.subr.bf16.mxu0 %v4480_v40  ;;  %v4540_v18 = vld [vmem:[#allocation5 + $0x484] ss:$16 sps:$4 sm:$0xff]   ;;  %v4538_v20 = vld [vmem:[#allocation5 + $0x480] ss:$16 sps:$4 sm:$0xff]  }
  0x4d   :  { %3271 = vmatprep.subr.bf16.mxu1 %v4482_v41  ;;  %v4543_v19 = vld [vmem:[#allocation5 + $0x684] ss:$16 sps:$4 sm:$0xff]   ;;  %v4541_v21 = vld [vmem:[#allocation5 + $0x680] ss:$16 sps:$4 sm:$0xff]  }
  0x4e   :  { %v4546_v22 = vld [vmem:[#allocation5 + $0x464] ss:$16 sps:$4 sm:$0xff]   ;;  %v4544_v24 = vld [vmem:[#allocation5 + $0x460] ss:$16 sps:$4 sm:$0xff]  }
  0x4f   :  { %3231 = vmatpush2.bf16.msra.mxu0 %v4484_v42  ;;  %v4549_v23 = vld [vmem:[#allocation5 + $0x664] ss:$16 sps:$4 sm:$0xff]   ;;  %v4547_v25 = vld [vmem:[#allocation5 + $0x660] ss:$16 sps:$4 sm:$0xff]  }
  0x50   :  { %3272 = vmatpush2.bf16.msra.mxu1 %v4485_v43  ;;  %3232 = vmatprep.subr.bf16.mxu0 %v4486_v44  ;;  %v4552_v26 = vld [vmem:[#allocation5 + $0x444] ss:$16 sps:$4 sm:$0xff]   ;;  %v4550_v28 = vld [vmem:[#allocation5 + $0x440] ss:$16 sps:$4 sm:$0xff]  }
  0x51   :  { %3273 = vmatprep.subr.bf16.mxu1 %v4488_v45  ;;  %v4555_v27 = vld [vmem:[#allocation5 + $0x644] ss:$16 sps:$4 sm:$0xff]   ;;  %v4553_v29 = vld [vmem:[#allocation5 + $0x640] ss:$16 sps:$4 sm:$0xff]  }
  0x52   :  { %v4558_v30 = vld [vmem:[#allocation5 + $0x424] ss:$16 sps:$4 sm:$0xff]   ;;  %v4556_v34 = vld [vmem:[#allocation5 + $0x420] ss:$16 sps:$4 sm:$0xff]  }
  0x53   :  { %3233 = vmatpush2.bf16.msra.mxu0 %v4490_v49  ;;  %v4561_v31 = vld [vmem:[#allocation5 + $0x624] ss:$16 sps:$4 sm:$0xff]   ;;  %v4559_v35 = vld [vmem:[#allocation5 + $0x620] ss:$16 sps:$4 sm:$0xff]  }
  0x54   :  { %3274 = vmatpush2.bf16.msra.mxu1 %v4491_v50  ;;  %3234 = vmatprep.subr.bf16.mxu0 %v4492_v52  ;;  %v5338_v32 = vld [vmem:[#allocation2 + $0x10] sm:$0xff] }
  0x55   :  { %3275 = vmatprep.subr.bf16.mxu1 %v4494_v53  ;;  %v5344_v36 = vcombine.high %v5338_v32, %v5338_v32  ;;  %v4564_v38 = vld [vmem:[#allocation5 + $0x404] ss:$16 sps:$4 sm:$0xff]   ;;  %v4562_v40 = vld [vmem:[#allocation5 + $0x400] ss:$16 sps:$4 sm:$0xff]  }
  0x56   :  { %v4567_v39 = vld [vmem:[#allocation5 + $0x604] ss:$16 sps:$4 sm:$0xff]   ;;  %v4565_v41 = vld [vmem:[#allocation5 + $0x600] ss:$16 sps:$4 sm:$0xff]  }
  0x57   :  { %3235 = vmatpush2.bf16.msra.mxu0 %v4496_v54  ;;  %v4570_v42 = vld [vmem:[#allocation5 + $0x5e4] ss:$16 sps:$4 sm:$0xff]   ;;  %v4568_v44 = vld [vmem:[#allocation5 + $0x5e0] ss:$16 sps:$4 sm:$0xff]  }
  0x58   :  { %3276 = vmatpush2.bf16.msra.mxu1 %v4497_v55  ;;  %3236 = vmatprep.subr.bf16.mxu0 %v4498_v56  ;;  %v4573_v43 = vld [vmem:[#allocation5 + $0x7e4] ss:$16 sps:$4 sm:$0xff]   ;;  %v4571_v45 = vld [vmem:[#allocation5 + $0x7e0] ss:$16 sps:$4 sm:$0xff]  }
  0x59   :  { %3277 = vmatprep.subr.bf16.mxu1 %v4500_v57  ;;  %v4576_v46 = vld [vmem:[#allocation5 + $0x5c4] ss:$16 sps:$4 sm:$0xff]   ;;  %v4574_v49 = vld [vmem:[#allocation5 + $0x5c0] ss:$16 sps:$4 sm:$0xff]  }
  0x5a   :  { %v4579_v48 = vld [vmem:[#allocation5 + $0x7c4] ss:$16 sps:$4 sm:$0xff]   ;;  %v4577_v50 = vld [vmem:[#allocation5 + $0x7c0] ss:$16 sps:$4 sm:$0xff]  }
  0x5b   :  { %3237 = vmatpush2.bf16.msra.mxu0 %v4502_v58  ;;  %v4582_v52 = vld [vmem:[#allocation5 + $0x5a4] ss:$16 sps:$4 sm:$0xff]   ;;  %v4580_v54 = vld [vmem:[#allocation5 + $0x5a0] ss:$16 sps:$4 sm:$0xff]  }
  0x5c   :  { %3278 = vmatpush2.bf16.msra.mxu1 %v4503_v59  ;;  %3238 = vmatprep.subr.bf16.mxu0 %v4504_v60  ;;  %v4585_v53 = vld [vmem:[#allocation5 + $0x7a4] ss:$16 sps:$4 sm:$0xff]   ;;  %v4583_v55 = vld [vmem:[#allocation5 + $0x7a0] ss:$16 sps:$4 sm:$0xff]  }
  0x5d   :  { %3279 = vmatprep.subr.bf16.mxu1 %v4506_v61  ;;  %v4588_v56 = vld [vmem:[#allocation5 + $0x584] ss:$16 sps:$4 sm:$0xff]   ;;  %v4586_v58 = vld [vmem:[#allocation5 + $0x580] ss:$16 sps:$4 sm:$0xff]  }
  0x5e   :  { %v4591_v57 = vld [vmem:[#allocation5 + $0x784] ss:$16 sps:$4 sm:$0xff]   ;;  %v4589_v59 = vld [vmem:[#allocation5 + $0x780] ss:$16 sps:$4 sm:$0xff]  }
  0x5f   :  { %3239 = vmatpush2.bf16.msra.mxu0 %v4508_v62  ;;  %v4594_v60 = vld [vmem:[#allocation5 + $0x564] ss:$16 sps:$4 sm:$0xff]   ;;  %v4592_v62 = vld [vmem:[#allocation5 + $0x560] ss:$16 sps:$4 sm:$0xff]  }
  0x60   :  { %3280 = vmatpush2.bf16.msra.mxu1 %v4509_v63  ;;  %3240 = vmatprep.subr.bf16.mxu0 %v4510_v0  ;;  %v4597_v61 = vld [vmem:[#allocation5 + $0x764] ss:$16 sps:$4 sm:$0xff]   ;;  %v4595_v63 = vld [vmem:[#allocation5 + $0x760] ss:$16 sps:$4 sm:$0xff]  }
  0x61   :  { %3281 = vmatprep.subr.bf16.mxu1 %v4512_v1  ;;  %v4600_v0 = vld [vmem:[#allocation5 + $0x544] ss:$16 sps:$4 sm:$0xff]  }
  0x62   :  { %v4603_v1 = vld [vmem:[#allocation5 + $0x744] ss:$16 sps:$4 sm:$0xff]  }
  0x63   :  { %3241 = vmatpush2.bf16.msra.mxu0 %v4514_v2  ;;  %v4598_v2 = vld [vmem:[#allocation5 + $0x540] ss:$16 sps:$4 sm:$0xff]  }
  0x64   :  { %3282 = vmatpush2.bf16.msra.mxu1 %v4515_v3  ;;  %3292 = vmatprep.subr.bf16.mxu0 %v4522_v4  ;;  %v4601_v3 = vld [vmem:[#allocation5 + $0x740] ss:$16 sps:$4 sm:$0xff]   ;;  %v4606_v4 = vld [vmem:[#allocation5 + $0x524] ss:$16 sps:$4 sm:$0xff]  }
  0x65   :  { %3333 = vmatprep.subr.bf16.mxu1 %v4525_v5  ;;  %v4609_v5 = vld [vmem:[#allocation5 + $0x724] ss:$16 sps:$4 sm:$0xff]  }
  0x66   :  { %3243 = vmatmul.mubr.bf16.vlgmr.msra.gmra.mxu0 %v5332_v6 }
  0x67   :  { %3284 = vmatmul.mubr.bf16.vlgmr.msra.gmra.mxu1 %v5334_v7  ;;  %3293 = vmatpush1.bf16.msra.mxu0 %v4520_v8  ;;  %v4604_v8 = vld [vmem:[#allocation5 + $0x520] ss:$16 sps:$4 sm:$0xff]  }
  0x68   :  { %3334 = vmatpush1.bf16.msra.mxu1 %v4523_v9  ;;  %3294 = vmatprep.subr.bf16.mxu0 %v4528_v10  ;;  %v4607_v9 = vld [vmem:[#allocation5 + $0x720] ss:$16 sps:$4 sm:$0xff]   ;;  %v4612_v10 = vld [vmem:[#allocation5 + $0x504] ss:$16 sps:$4 sm:$0xff]  }
  0x69   :  { %3335 = vmatprep.subr.bf16.mxu1 %v4531_v11  ;;  %3324 = vmatprep.mubr.bf16.mxu0 %v5344_v36  ;;  %v4615_v11 = vld [vmem:[#allocation5 + $0x704] ss:$16 sps:$4 sm:$0xff]  }
  0x6a   :  { %3365 = vmatprep.mubr.bf16.mxu1 %v5348_v37 }
  0x6b   :  { %3295 = vmatpush1.bf16.msra.mxu0 %v4526_v12  ;;  %v4610_v12 = vld [vmem:[#allocation5 + $0x500] ss:$16 sps:$4 sm:$0xff]  }
  0x6c   :  { %3336 = vmatpush1.bf16.msra.mxu1 %v4529_v13  ;;  %3296 = vmatprep.subr.bf16.mxu0 %v4534_v14  ;;  %v4613_v13 = vld [vmem:[#allocation5 + $0x700] ss:$16 sps:$4 sm:$0xff]   ;;  %v4622_v14 = vld [vmem:[#allocation5 + $0x8e4] ss:$16 sps:$4 sm:$0xff]  }
  0x6d   :  { %3337 = vmatprep.subr.bf16.mxu1 %v4537_v15  ;;  %v4625_v15 = vld [vmem:[#allocation5 + $0xae4] ss:$16 sps:$4 sm:$0xff]  }
  0x6f   :  { %3297 = vmatpush1.bf16.msra.mxu0 %v4532_v16  ;;  %v5354_v16 = vcombine.low %v5338_v32, %v5338_v32  ;;  %v4640_v32 = vld [vmem:[#allocation5 + $0x884] ss:$16 sps:$4 sm:$0xff]  }
  0x70   :  { %3338 = vmatpush1.bf16.msra.mxu1 %v4535_v17  ;;  %3298 = vmatprep.subr.bf16.mxu0 %v4540_v18  ;;  %v5358_v17 = vcombine.low %v5340_v33, %v5340_v33  ;;  %v4620_v18 = vld [vmem:[#allocation5 + $0x8e0] ss:$16 sps:$4 sm:$0xff]   ;;  %v4643_v33 = vld [vmem:[#allocation5 + $0xa84] ss:$16 sps:$4 sm:$0xff]  }
  0x71   :  { %3339 = vmatprep.subr.bf16.mxu1 %v4543_v19  ;;  %v4623_v19 = vld [vmem:[#allocation5 + $0xae0] ss:$16 sps:$4 sm:$0xff]  }
  0x73   :  { %3299 = vmatpush1.bf16.msra.mxu0 %v4538_v20  ;;  %v4628_v20 = vld [vmem:[#allocation5 + $0x8c4] ss:$16 sps:$4 sm:$0xff]  }
  0x74   :  { %3340 = vmatpush1.bf16.msra.mxu1 %v4541_v21  ;;  %3300 = vmatprep.subr.bf16.mxu0 %v4546_v22  ;;  %v4631_v21 = vld [vmem:[#allocation5 + $0xac4] ss:$16 sps:$4 sm:$0xff]  }
  0x75   :  { %3341 = vmatprep.subr.bf16.mxu1 %v4549_v23  ;;  %v5360_v22 = vld [vmem:[#allocation2 + $0x20] sm:$0xff]  ;;  %v5362_v23 = vld [vmem:[#allocation2 + $0x28] sm:$0xff] }
  0x77   :  { %3301 = vmatpush1.bf16.msra.mxu0 %v4544_v24  ;;  %v5366_v24 = vcombine.high %v5360_v22, %v5360_v22 }
  0x78   :  { %3342 = vmatpush1.bf16.msra.mxu1 %v4547_v25  ;;  %3302 = vmatprep.subr.bf16.mxu0 %v4552_v26  ;;  %v5370_v25 = vcombine.high %v5362_v23, %v5362_v23  ;;  %v4626_v26 = vld [vmem:[#allocation5 + $0x8c0] ss:$16 sps:$4 sm:$0xff]  }
  0x79   :  { %3343 = vmatprep.subr.bf16.mxu1 %v4555_v27  ;;  %v4629_v27 = vld [vmem:[#allocation5 + $0xac0] ss:$16 sps:$4 sm:$0xff]  }
  0x7b   :  { %3303 = vmatpush1.bf16.msra.mxu0 %v4550_v28  ;;  %v4634_v28 = vld [vmem:[#allocation5 + $0x8a4] ss:$16 sps:$4 sm:$0xff]  }
  0x7c   :  { %3344 = vmatpush1.bf16.msra.mxu1 %v4553_v29  ;;  %3304 = vmatprep.subr.bf16.mxu0 %v4558_v30  ;;  %v4637_v29 = vld [vmem:[#allocation5 + $0xaa4] ss:$16 sps:$4 sm:$0xff]   ;;  %v4632_v30 = vld [vmem:[#allocation5 + $0x8a0] ss:$16 sps:$4 sm:$0xff]  }
  0x7d   :  { %3345 = vmatprep.subr.bf16.mxu1 %v4561_v31  ;;  %v4635_v31 = vld [vmem:[#allocation5 + $0xaa0] ss:$16 sps:$4 sm:$0xff]  }
  0x7f   :  { %3305 = vmatpush1.bf16.msra.mxu0 %v4556_v34  ;;  %v4638_v34 = vld [vmem:[#allocation5 + $0x880] ss:$16 sps:$4 sm:$0xff]  }
  0x80   :  { %3346 = vmatpush1.bf16.msra.mxu1 %v4559_v35  ;;  %3306 = vmatprep.subr.bf16.mxu0 %v4564_v38  ;;  %v4641_v35 = vld [vmem:[#allocation5 + $0xa80] ss:$16 sps:$4 sm:$0xff]   ;;  %v4646_v38 = vld [vmem:[#allocation5 + $0x864] ss:$16 sps:$4 sm:$0xff]  }
  0x81   :  { %3347 = vmatprep.subr.bf16.mxu1 %v4567_v39  ;;  %v4649_v39 = vld [vmem:[#allocation5 + $0xa64] ss:$16 sps:$4 sm:$0xff]  }
  0x83   :  { %3307 = vmatpush1.bf16.msra.mxu0 %v4562_v40  ;;  %v4644_v40 = vld [vmem:[#allocation5 + $0x860] ss:$16 sps:$4 sm:$0xff]  }
  0x84   :  { %3348 = vmatpush1.bf16.msra.mxu1 %v4565_v41  ;;  %3308 = vmatprep.subr.bf16.mxu0 %v4570_v42  ;;  %v4647_v41 = vld [vmem:[#allocation5 + $0xa60] ss:$16 sps:$4 sm:$0xff]   ;;  %v4652_v42 = vld [vmem:[#allocation5 + $0x844] ss:$16 sps:$4 sm:$0xff]  }
  0x85   :  { %3349 = vmatprep.subr.bf16.mxu1 %v4573_v43  ;;  %v4655_v43 = vld [vmem:[#allocation5 + $0xa44] ss:$16 sps:$4 sm:$0xff]  }
  0x87   :  { %3309 = vmatpush2.bf16.msra.mxu0 %v4568_v44  ;;  %v4650_v44 = vld [vmem:[#allocation5 + $0x840] ss:$16 sps:$4 sm:$0xff]  }
  0x88   :  { %3350 = vmatpush2.bf16.msra.mxu1 %v4571_v45  ;;  %3310 = vmatprep.subr.bf16.mxu0 %v4576_v46  ;;  %v4653_v45 = vld [vmem:[#allocation5 + $0xa40] ss:$16 sps:$4 sm:$0xff]   ;;  %v4658_v46 = vld [vmem:[#allocation5 + $0x824] ss:$16 sps:$4 sm:$0xff]  }
  0x89   :  { %3351 = vmatprep.subr.bf16.mxu1 %v4579_v48  ;;  %v4661_v48 = vld [vmem:[#allocation5 + $0xa24] ss:$16 sps:$4 sm:$0xff]  }
  0x8b   :  { %3311 = vmatpush2.bf16.msra.mxu0 %v4574_v49  ;;  %v4656_v49 = vld [vmem:[#allocation5 + $0x820] ss:$16 sps:$4 sm:$0xff]  }
  0x8c   :  { %3352 = vmatpush2.bf16.msra.mxu1 %v4577_v50  ;;  %3312 = vmatprep.subr.bf16.mxu0 %v4582_v52  ;;  %v4659_v50 = vld [vmem:[#allocation5 + $0xa20] ss:$16 sps:$4 sm:$0xff]   ;;  %v4664_v52 = vld [vmem:[#allocation5 + $0x804] ss:$16 sps:$4 sm:$0xff]  }
  0x8d   :  { %3353 = vmatprep.subr.bf16.mxu1 %v4585_v53  ;;  %v4667_v53 = vld [vmem:[#allocation5 + $0xa04] ss:$16 sps:$4 sm:$0xff]  }
  0x8f   :  { %3313 = vmatpush2.bf16.msra.mxu0 %v4580_v54  ;;  %v4662_v54 = vld [vmem:[#allocation5 + $0x800] ss:$16 sps:$4 sm:$0xff]  }
  0x90   :  { %3354 = vmatpush2.bf16.msra.mxu1 %v4583_v55  ;;  %3314 = vmatprep.subr.bf16.mxu0 %v4588_v56  ;;  %v4665_v55 = vld [vmem:[#allocation5 + $0xa00] ss:$16 sps:$4 sm:$0xff]   ;;  %v4670_v56 = vld [vmem:[#allocation5 + $0x9e4] ss:$16 sps:$4 sm:$0xff]  }
  0x91   :  { %3355 = vmatprep.subr.bf16.mxu1 %v4591_v57  ;;  %v4673_v57 = vld [vmem:[#allocation5 + $0xbe4] ss:$16 sps:$4 sm:$0xff]  }
  0x93   :  { %3315 = vmatpush2.bf16.msra.mxu0 %v4586_v58  ;;  %v4668_v58 = vld [vmem:[#allocation5 + $0x9e0] ss:$16 sps:$4 sm:$0xff]  }
  0x94   :  { %3356 = vmatpush2.bf16.msra.mxu1 %v4589_v59  ;;  %3316 = vmatprep.subr.bf16.mxu0 %v4594_v60  ;;  %v4671_v59 = vld [vmem:[#allocation5 + $0xbe0] ss:$16 sps:$4 sm:$0xff]   ;;  %v4676_v60 = vld [vmem:[#allocation5 + $0x9c4] ss:$16 sps:$4 sm:$0xff]  }
  0x95   :  { %3357 = vmatprep.subr.bf16.mxu1 %v4597_v61  ;;  %v4679_v61 = vld [vmem:[#allocation5 + $0xbc4] ss:$16 sps:$4 sm:$0xff]  }
  0x97   :  { %3317 = vmatpush2.bf16.msra.mxu0 %v4592_v62  ;;  %v4674_v62 = vld [vmem:[#allocation5 + $0x9c0] ss:$16 sps:$4 sm:$0xff]  }
  0x98   :  { %3358 = vmatpush2.bf16.msra.mxu1 %v4595_v63  ;;  %3318 = vmatprep.subr.bf16.mxu0 %v4600_v0  ;;  %v4677_v63 = vld [vmem:[#allocation5 + $0xbc0] ss:$16 sps:$4 sm:$0xff]   ;;  %v4682_v0 = vld [vmem:[#allocation5 + $0x9a4] ss:$16 sps:$4 sm:$0xff]  }
  0x99   :  { %3359 = vmatprep.subr.bf16.mxu1 %v4603_v1  ;;  %v4685_v1 = vld [vmem:[#allocation5 + $0xba4] ss:$16 sps:$4 sm:$0xff]  }
  0x9b   :  { %3319 = vmatpush2.bf16.msra.mxu0 %v4598_v2  ;;  %v4680_v2 = vld [vmem:[#allocation5 + $0x9a0] ss:$16 sps:$4 sm:$0xff]  }
  0x9c   :  { %3360 = vmatpush2.bf16.msra.mxu1 %v4601_v3  ;;  %3320 = vmatprep.subr.bf16.mxu0 %v4606_v4  ;;  %v4683_v3 = vld [vmem:[#allocation5 + $0xba0] ss:$16 sps:$4 sm:$0xff]   ;;  %v4688_v4 = vld [vmem:[#allocation5 + $0x984] ss:$16 sps:$4 sm:$0xff]  }
  0x9d   :  { %3361 = vmatprep.subr.bf16.mxu1 %v4609_v5  ;;  %v4691_v5 = vld [vmem:[#allocation5 + $0xb84] ss:$16 sps:$4 sm:$0xff]  }
  0x9f   :  { %3321 = vmatpush2.bf16.msra.mxu0 %v4604_v8  ;;  %v4686_v8 = vld [vmem:[#allocation5 + $0x980] ss:$16 sps:$4 sm:$0xff]  }
  0xa0   :  { %3362 = vmatpush2.bf16.msra.mxu1 %v4607_v9  ;;  %3322 = vmatprep.subr.bf16.mxu0 %v4612_v10  ;;  %v4689_v9 = vld [vmem:[#allocation5 + $0xb80] ss:$16 sps:$4 sm:$0xff]   ;;  %v4694_v10 = vld [vmem:[#allocation5 + $0x964] ss:$16 sps:$4 sm:$0xff]  }
  0xa1   :  { %3363 = vmatprep.subr.bf16.mxu1 %v4615_v11  ;;  %v4697_v11 = vld [vmem:[#allocation5 + $0xb64] ss:$16 sps:$4 sm:$0xff]  }
  0xa3   :  { %3323 = vmatpush2.bf16.msra.mxu0 %v4610_v12  ;;  %v4692_v12 = vld [vmem:[#allocation5 + $0x960] ss:$16 sps:$4 sm:$0xff]  }
  0xa4   :  { %3364 = vmatpush2.bf16.msra.mxu1 %v4613_v13  ;;  %3374 = vmatprep.subr.bf16.mxu0 %v4622_v14  ;;  %v4695_v13 = vld [vmem:[#allocation5 + $0xb60] ss:$16 sps:$4 sm:$0xff]   ;;  %v4700_v14 = vld [vmem:[#allocation5 + $0x944] ss:$16 sps:$4 sm:$0xff]  }
  0xa5   :  { %3415 = vmatprep.subr.bf16.mxu1 %v4625_v15  ;;  %v4703_v15 = vld [vmem:[#allocation5 + $0xb44] ss:$16 sps:$4 sm:$0xff]  }
  0xa6   :  { %3325 = vmatmul.mubr.bf16.vlgmr.msra.gmra.mxu0 %v5354_v16 }
  0xa7   :  { %3366 = vmatmul.mubr.bf16.vlgmr.msra.gmra.mxu1 %v5358_v17  ;;  %3375 = vmatpush1.bf16.msra.mxu0 %v4620_v18  ;;  %v4698_v18 = vld [vmem:[#allocation5 + $0x940] ss:$16 sps:$4 sm:$0xff]  }
  0xa8   :  { %3416 = vmatpush1.bf16.msra.mxu1 %v4623_v19  ;;  %3376 = vmatprep.subr.bf16.mxu0 %v4628_v20  ;;  %v4701_v19 = vld [vmem:[#allocation5 + $0xb40] ss:$16 sps:$4 sm:$0xff]   ;;  %v4706_v20 = vld [vmem:[#allocation5 + $0x924] ss:$16 sps:$4 sm:$0xff]  }
  0xa9   :  { %3417 = vmatprep.subr.bf16.mxu1 %v4631_v21  ;;  %3406 = vmatprep.mubr.bf16.mxu0 %v5366_v24  ;;  %v4709_v21 = vld [vmem:[#allocation5 + $0xb24] ss:$16 sps:$4 sm:$0xff]  }
  0xaa   :  { %3447 = vmatprep.mubr.bf16.mxu1 %v5370_v25 }
  0xab   :  { %3377 = vmatpush1.bf16.msra.mxu0 %v4626_v26  ;;  %v4704_v26 = vld [vmem:[#allocation5 + $0x920] ss:$16 sps:$4 sm:$0xff]  }
  0xac   :  { %3418 = vmatpush1.bf16.msra.mxu1 %v4629_v27  ;;  %3378 = vmatprep.subr.bf16.mxu0 %v4634_v28  ;;  %v4707_v27 = vld [vmem:[#allocation5 + $0xb20] ss:$16 sps:$4 sm:$0xff]   ;;  %v4712_v28 = vld [vmem:[#allocation5 + $0x904] ss:$16 sps:$4 sm:$0xff]  }
  0xad   :  { %3419 = vmatprep.subr.bf16.mxu1 %v4637_v29  ;;  %v4715_v29 = vld [vmem:[#allocation5 + $0xb04] ss:$16 sps:$4 sm:$0xff]  }
  0xaf   :  { %3379 = vmatpush1.bf16.msra.mxu0 %v4632_v30  ;;  %v4710_v30 = vld [vmem:[#allocation5 + $0x900] ss:$16 sps:$4 sm:$0xff]  }
  0xb0   :  { %3420 = vmatpush1.bf16.msra.mxu1 %v4635_v31  ;;  %3380 = vmatprep.subr.bf16.mxu0 %v4640_v32  ;;  %v4713_v31 = vld [vmem:[#allocation5 + $0xb00] ss:$16 sps:$4 sm:$0xff]   ;;  %v4722_v32 = vld [vmem:[#allocation5 + $0xce4] ss:$16 sps:$4 sm:$0xff]  }
  0xb1   :  { %3421 = vmatprep.subr.bf16.mxu1 %v4643_v33  ;;  %v4725_v33 = vld [vmem:[#allocation5 + $0xee4] ss:$16 sps:$4 sm:$0xff]  }
  0xb3   :  { %3381 = vmatpush1.bf16.msra.mxu0 %v4638_v34  ;;  %v4720_v34 = vld [vmem:[#allocation5 + $0xce0] ss:$16 sps:$4 sm:$0xff]  }
  0xb4   :  { %3422 = vmatpush1.bf16.msra.mxu1 %v4641_v35  ;;  %3382 = vmatprep.subr.bf16.mxu0 %v4646_v38  ;;  %v5376_v35 = vld [vmem:[#allocation2 + $0x30] sm:$0xff]  ;;  %v5380_v38 = vcombine.low %v5360_v22, %v5360_v22 }
  0xb5   :  { %3423 = vmatprep.subr.bf16.mxu1 %v4649_v39  ;;  %v5384_v39 = vcombine.low %v5362_v23, %v5362_v23  ;;  %v4726_v23 = vld [vmem:[#allocation5 + $0xcc0] ss:$16 sps:$4 sm:$0xff]  }
  0xb7   :  { %3383 = vmatpush1.bf16.msra.mxu0 %v4644_v40  ;;  %v5386_v40 = vld [vmem:[#allocation2 + $0x38] sm:$0xff] }
  0xb8   :  { %3424 = vmatpush1.bf16.msra.mxu1 %v4647_v41  ;;  %3384 = vmatprep.subr.bf16.mxu0 %v4652_v42  ;;  %v4723_v41 = vld [vmem:[#allocation5 + $0xee0] ss:$16 sps:$4 sm:$0xff]   ;;  %v4728_v42 = vld [vmem:[#allocation5 + $0xcc4] ss:$16 sps:$4 sm:$0xff]   ;;  %v5394_v22 = vcombine.high %v5386_v40, %v5386_v40 }
  0xb9   :  { %3425 = vmatprep.subr.bf16.mxu1 %v4655_v43  ;;  %v4731_v43 = vld [vmem:[#allocation5 + $0xec4] ss:$16 sps:$4 sm:$0xff]  }
  0xbb   :  { %3385 = vmatpush1.bf16.msra.mxu0 %v4650_v44  ;;  %v5390_v44 = vcombine.high %v5376_v35, %v5376_v35 }
  0xbc   :  { %3426 = vmatpush1.bf16.msra.mxu1 %v4653_v45  ;;  %3386 = vmatprep.subr.bf16.mxu0 %v4658_v46  ;;  %v4729_v45 = vld [vmem:[#allocation5 + $0xec0] ss:$16 sps:$4 sm:$0xff]   ;;  %v4734_v46 = vld [vmem:[#allocation5 + $0xca4] ss:$16 sps:$4 sm:$0xff]  }
  0xbd   :  { %3427 = vmatprep.subr.bf16.mxu1 %v4661_v48  ;;  %v4737_v48 = vld [vmem:[#allocation5 + $0xea4] ss:$16 sps:$4 sm:$0xff]  }
  0xbf   :  { %3387 = vmatpush1.bf16.msra.mxu0 %v4656_v49  ;;  %v4732_v49 = vld [vmem:[#allocation5 + $0xca0] ss:$16 sps:$4 sm:$0xff]  }
  0xc0   :  { %3428 = vmatpush1.bf16.msra.mxu1 %v4659_v50  ;;  %3388 = vmatprep.subr.bf16.mxu0 %v4664_v52  ;;  %v4735_v50 = vld [vmem:[#allocation5 + $0xea0] ss:$16 sps:$4 sm:$0xff]   ;;  %v4740_v52 = vld [vmem:[#allocation5 + $0xc84] ss:$16 sps:$4 sm:$0xff]  }
  0xc1   :  { %3429 = vmatprep.subr.bf16.mxu1 %v4667_v53  ;;  %v4743_v53 = vld [vmem:[#allocation5 + $0xe84] ss:$16 sps:$4 sm:$0xff]  }
  0xc3   :  { %3389 = vmatpush1.bf16.msra.mxu0 %v4662_v54  ;;  %v4738_v54 = vld [vmem:[#allocation5 + $0xc80] ss:$16 sps:$4 sm:$0xff]  }
  0xc4   :  { %3430 = vmatpush1.bf16.msra.mxu1 %v4665_v55  ;;  %3390 = vmatprep.subr.bf16.mxu0 %v4670_v56  ;;  %v4741_v55 = vld [vmem:[#allocation5 + $0xe80] ss:$16 sps:$4 sm:$0xff]   ;;  %v4746_v56 = vld [vmem:[#allocation5 + $0xc64] ss:$16 sps:$4 sm:$0xff]  }
  0xc5   :  { %3431 = vmatprep.subr.bf16.mxu1 %v4673_v57  ;;  %v4749_v57 = vld [vmem:[#allocation5 + $0xe64] ss:$16 sps:$4 sm:$0xff]  }
  0xc7   :  { %3391 = vmatpush2.bf16.msra.mxu0 %v4668_v58  ;;  %v4744_v58 = vld [vmem:[#allocation5 + $0xc60] ss:$16 sps:$4 sm:$0xff]  }
  0xc8   :  { %3432 = vmatpush2.bf16.msra.mxu1 %v4671_v59  ;;  %3392 = vmatprep.subr.bf16.mxu0 %v4676_v60  ;;  %v4747_v59 = vld [vmem:[#allocation5 + $0xe60] ss:$16 sps:$4 sm:$0xff]   ;;  %v4752_v60 = vld [vmem:[#allocation5 + $0xc44] ss:$16 sps:$4 sm:$0xff]  }
  0xc9   :  { %3433 = vmatprep.subr.bf16.mxu1 %v4679_v61  ;;  %v4755_v61 = vld [vmem:[#allocation5 + $0xe44] ss:$16 sps:$4 sm:$0xff]  }
  0xcb   :  { %3393 = vmatpush2.bf16.msra.mxu0 %v4674_v62  ;;  %v4750_v62 = vld [vmem:[#allocation5 + $0xc40] ss:$16 sps:$4 sm:$0xff]  }
  0xcc   :  { %3434 = vmatpush2.bf16.msra.mxu1 %v4677_v63  ;;  %3394 = vmatprep.subr.bf16.mxu0 %v4682_v0  ;;  %v4753_v63 = vld [vmem:[#allocation5 + $0xe40] ss:$16 sps:$4 sm:$0xff]   ;;  %v4758_v0 = vld [vmem:[#allocation5 + $0xc24] ss:$16 sps:$4 sm:$0xff]  }
  0xcd   :  { %3435 = vmatprep.subr.bf16.mxu1 %v4685_v1  ;;  %v4761_v1 = vld [vmem:[#allocation5 + $0xe24] ss:$16 sps:$4 sm:$0xff]  }
  0xcf   :  { %3395 = vmatpush2.bf16.msra.mxu0 %v4680_v2  ;;  %v4756_v2 = vld [vmem:[#allocation5 + $0xc20] ss:$16 sps:$4 sm:$0xff]  }
  0xd0   :  { %3436 = vmatpush2.bf16.msra.mxu1 %v4683_v3  ;;  %3396 = vmatprep.subr.bf16.mxu0 %v4688_v4  ;;  %v4759_v3 = vld [vmem:[#allocation5 + $0xe20] ss:$16 sps:$4 sm:$0xff]   ;;  %v4764_v4 = vld [vmem:[#allocation5 + $0xc04] ss:$16 sps:$4 sm:$0xff]  }
  0xd1   :  { %3437 = vmatprep.subr.bf16.mxu1 %v4691_v5  ;;  %v4767_v5 = vld [vmem:[#allocation5 + $0xe04] ss:$16 sps:$4 sm:$0xff]  }
  0xd3   :  { %3397 = vmatpush2.bf16.msra.mxu0 %v4686_v8  ;;  %v4762_v8 = vld [vmem:[#allocation5 + $0xc00] ss:$16 sps:$4 sm:$0xff]  }
  0xd4   :  { %3438 = vmatpush2.bf16.msra.mxu1 %v4689_v9  ;;  %3398 = vmatprep.subr.bf16.mxu0 %v4694_v10  ;;  %v4765_v9 = vld [vmem:[#allocation5 + $0xe00] ss:$16 sps:$4 sm:$0xff]   ;;  %v4770_v10 = vld [vmem:[#allocation5 + $0xde4] ss:$16 sps:$4 sm:$0xff]  }
  0xd5   :  { %3439 = vmatprep.subr.bf16.mxu1 %v4697_v11  ;;  %v4773_v11 = vld [vmem:[#allocation5 + $0xfe4] ss:$16 sps:$4 sm:$0xff]  }
  0xd7   :  { %3399 = vmatpush2.bf16.msra.mxu0 %v4692_v12  ;;  %v4768_v12 = vld [vmem:[#allocation5 + $0xde0] ss:$16 sps:$4 sm:$0xff]  }
  0xd8   :  { %3440 = vmatpush2.bf16.msra.mxu1 %v4695_v13  ;;  %3400 = vmatprep.subr.bf16.mxu0 %v4700_v14  ;;  %v4771_v13 = vld [vmem:[#allocation5 + $0xfe0] ss:$16 sps:$4 sm:$0xff]   ;;  %v4776_v14 = vld [vmem:[#allocation5 + $0xdc4] ss:$16 sps:$4 sm:$0xff]  }
  0xd9   :  { %3441 = vmatprep.subr.bf16.mxu1 %v4703_v15  ;;  %v4779_v15 = vld [vmem:[#allocation5 + $0xfc4] ss:$16 sps:$4 sm:$0xff]  }
  0xdb   :  { %3401 = vmatpush2.bf16.msra.mxu0 %v4698_v18  ;;  %v4774_v18 = vld [vmem:[#allocation5 + $0xdc0] ss:$16 sps:$4 sm:$0xff]  }
  0xdc   :  { %3442 = vmatpush2.bf16.msra.mxu1 %v4701_v19  ;;  %3402 = vmatprep.subr.bf16.mxu0 %v4706_v20  ;;  %v4777_v19 = vld [vmem:[#allocation5 + $0xfc0] ss:$16 sps:$4 sm:$0xff]   ;;  %v4782_v20 = vld [vmem:[#allocation5 + $0xda4] ss:$16 sps:$4 sm:$0xff]  }
  0xdd   :  { %3443 = vmatprep.subr.bf16.mxu1 %v4709_v21  ;;  %v4785_v21 = vld [vmem:[#allocation5 + $0xfa4] ss:$16 sps:$4 sm:$0xff]  }
  0xdf   :  { %3403 = vmatpush2.bf16.msra.mxu0 %v4704_v26  ;;  %v4780_v26 = vld [vmem:[#allocation5 + $0xda0] ss:$16 sps:$4 sm:$0xff]  }
  0xe0   :  { %3444 = vmatpush2.bf16.msra.mxu1 %v4707_v27  ;;  %3404 = vmatprep.subr.bf16.mxu0 %v4712_v28  ;;  %v4783_v27 = vld [vmem:[#allocation5 + $0xfa0] ss:$16 sps:$4 sm:$0xff]   ;;  %v4788_v28 = vld [vmem:[#allocation5 + $0xd84] ss:$16 sps:$4 sm:$0xff]  }
  0xe1   :  { %3445 = vmatprep.subr.bf16.mxu1 %v4715_v29  ;;  %v4791_v29 = vld [vmem:[#allocation5 + $0xf84] ss:$16 sps:$4 sm:$0xff]  }
  0xe3   :  { %3405 = vmatpush2.bf16.msra.mxu0 %v4710_v30  ;;  %v4786_v30 = vld [vmem:[#allocation5 + $0xd80] ss:$16 sps:$4 sm:$0xff]  }
  0xe4   :  { %3446 = vmatpush2.bf16.msra.mxu1 %v4713_v31  ;;  %3456 = vmatprep.subr.bf16.mxu0 %v4722_v32  ;;  %v4789_v31 = vld [vmem:[#allocation5 + $0xf80] ss:$16 sps:$4 sm:$0xff]   ;;  %v4794_v32 = vld [vmem:[#allocation5 + $0xd64] ss:$16 sps:$4 sm:$0xff]  }
  0xe5   :  { %3497 = vmatprep.subr.bf16.mxu1 %v4725_v33  ;;  %v4797_v33 = vld [vmem:[#allocation5 + $0xf64] ss:$16 sps:$4 sm:$0xff]  }
  0xe6   :  { %3407 = vmatmul.mubr.bf16.vlgmr.msra.gmra.mxu0 %v5380_v38 }
  0xe7   :  { %3448 = vmatmul.mubr.bf16.vlgmr.msra.gmra.mxu1 %v5384_v39  ;;  %3457 = vmatpush1.bf16.msra.mxu0 %v4720_v34  ;;  %v4792_v34 = vld [vmem:[#allocation5 + $0xd60] ss:$16 sps:$4 sm:$0xff]  }
  0xe8   :  { %3498 = vmatpush1.bf16.msra.mxu1 %v4723_v41  ;;  %3458 = vmatprep.subr.bf16.mxu0 %v4728_v42  ;;  %v4795_v41 = vld [vmem:[#allocation5 + $0xf60] ss:$16 sps:$4 sm:$0xff]   ;;  %v4800_v42 = vld [vmem:[#allocation5 + $0xd44] ss:$16 sps:$4 sm:$0xff]  }
  0xe9   :  { %3499 = vmatprep.subr.bf16.mxu1 %v4731_v43  ;;  %3488 = vmatprep.mubr.bf16.mxu0 %v5390_v44  ;;  %v4803_v43 = vld [vmem:[#allocation5 + $0xf44] ss:$16 sps:$4 sm:$0xff]  }
  0xea   :  { %3529 = vmatprep.mubr.bf16.mxu1 %v5394_v22 }
  0xeb   :  { %3459 = vmatpush1.bf16.msra.mxu0 %v4726_v23  ;;  %v4798_v23 = vld [vmem:[#allocation5 + $0xd40] ss:$16 sps:$4 sm:$0xff]  }
  0xec   :  { %3500 = vmatpush1.bf16.msra.mxu1 %v4729_v45  ;;  %3460 = vmatprep.subr.bf16.mxu0 %v4734_v46  ;;  %v4801_v45 = vld [vmem:[#allocation5 + $0xf40] ss:$16 sps:$4 sm:$0xff]   ;;  %v574_v46 = vlaneseq }
  0xed   :  { %3501 = vmatprep.subr.bf16.mxu1 %v4737_v48  ;;  %v4806_v48 = vld [vmem:[#allocation5 + $0xd24] ss:$16 sps:$4 sm:$0xff]  }
  0xef   :  { %3461 = vmatpush1.bf16.msra.mxu0 %v4732_v49  ;;  %v4809_v49 = vld [vmem:[#allocation5 + $0xf24] ss:$16 sps:$4 sm:$0xff]  }
  0xf0   :  { %3502 = vmatpush1.bf16.msra.mxu1 %v4735_v50  ;;  %3462 = vmatprep.subr.bf16.mxu0 %v4740_v52  ;;  %v4804_v50 = vld [vmem:[#allocation5 + $0xd20] ss:$16 sps:$4 sm:$0xff]  }
  0xf1   :  { %3503 = vmatprep.subr.bf16.mxu1 %v4743_v53  ;;  %v4807_v52 = vld [vmem:[#allocation5 + $0xf20] ss:$16 sps:$4 sm:$0xff]   ;;  %v5400_v53 = vshrl.u32 %v574_v46, 7  ;;  %v4853_v46 = vld [vmem:[#allocation5 + $0x248] ss:$16 sps:$4 sm:$0xff]  }
  0xf3   :  { %3463 = vmatpush1.bf16.msra.mxu0 %v4738_v54  ;;  %v4812_v54 = vld [vmem:[#allocation5 + $0xd04] ss:$16 sps:$4 sm:$0xff]  }
  0xf4   :  { %3504 = vmatpush1.bf16.msra.mxu1 %v4741_v55  ;;  %3464 = vmatprep.subr.bf16.mxu0 %v4746_v56  ;;  %v4815_v55 = vld [vmem:[#allocation5 + $0xf04] ss:$16 sps:$4 sm:$0xff]   ;;  %v4810_v56 = vld [vmem:[#allocation5 + $0xd00] ss:$16 sps:$4 sm:$0xff]  }
  0xf5   :  { %3505 = vmatprep.subr.bf16.mxu1 %v4749_v57  ;;  %v4813_v57 = vld [vmem:[#allocation5 + $0xf00] ss:$16 sps:$4 sm:$0xff]  }
  0xf7   :  { %3465 = vmatpush1.bf16.msra.mxu0 %v4744_v58  ;;  %v572_v58 = vld [vmem:[#allocation7] sm:$0xf] }
  0xf8   :  { %3506 = vmatpush1.bf16.msra.mxu1 %v4747_v59  ;;  %3466 = vmatprep.subr.bf16.mxu0 %v4752_v60  ;;  %v576_v59 = vsub.s32 0, %v5400_v53  ;;  %v4822_v60 = vld [vmem:[#allocation5 + $0xec] ss:$16 sps:$4 sm:$0xff]  }
  0xf9   :  { %3507 = vmatprep.subr.bf16.mxu1 %v4755_v61  ;;  %v4825_v61 = vld [vmem:[#allocation5 + $0x2ec] ss:$16 sps:$4 sm:$0xff]  }
  0xfb   :  { %3467 = vmatpush1.bf16.msra.mxu0 %v4750_v62  ;;  %v580_v62 = vsub.s32 1, %v5400_v53 }
  0xfc   :  { %3508 = vmatpush1.bf16.msra.mxu1 %v4753_v63  ;;  %3468 = vmatprep.subr.bf16.mxu0 %v4758_v0  ;;  %v5406_v63 = vcombine.low %v5376_v35, %v5376_v35  ;;  %v5410_v0 = vcombine.low %v5386_v40, %v5386_v40  ;;  %v4826_v35 = vld [vmem:[#allocation5 + $0xc8] ss:$16 sps:$4 sm:$0xff]  }
  0xfd   :  { %3509 = vmatprep.subr.bf16.mxu1 %v4761_v1  ;;  %v4820_v1 = vld [vmem:[#allocation5 + $0xe8] ss:$16 sps:$4 sm:$0xff]  }
  0xfe   :  { %v4829_v40 = vld [vmem:[#allocation5 + $0x2c8] ss:$16 sps:$4 sm:$0xff]  }
  0xff   :  { %3469 = vmatpush1.bf16.msra.mxu0 %v4756_v2  ;;  %v577_v2 = vrot.slane %v572_v58, %v576_v59  ;;  %v4873_v59 = vld [vmem:[#allocation5 + $0x3ec] ss:$16 sps:$4 sm:$0xff]  }
 0x100   :  { %3510 = vmatpush1.bf16.msra.mxu1 %v4759_v3  ;;  %3470 = vmatprep.subr.bf16.mxu0 %v4764_v4  ;;  %v4823_v3 = vld [vmem:[#allocation5 + $0x2e8] ss:$16 sps:$4 sm:$0xff]   ;;  %v4828_v4 = vld [vmem:[#allocation5 + $0xcc] ss:$16 sps:$4 sm:$0xff]  }
 0x101   :  { %3511 = vmatprep.subr.bf16.mxu1 %v4767_v5  ;;  %v4831_v5 = vld [vmem:[#allocation5 + $0x2cc] ss:$16 sps:$4 sm:$0xff]  }
 0x103   :  { %3471 = vmatpush1.bf16.msra.mxu0 %v4762_v8  ;;  %v581_v8 = vrot.slane %v572_v58, %v580_v62  ;;  %v4870_v58 = vld [vmem:[#allocation5 + $0x1ec] ss:$16 sps:$4 sm:$0xff]  }
 0x104   :  { %3512 = vmatpush1.bf16.msra.mxu1 %v4765_v9  ;;  %3472 = vmatprep.subr.bf16.mxu0 %v4770_v10  ;;  %v4876_v62 = vld [vmem:[#allocation5 + $0x1cc] ss:$16 sps:$4 sm:$0xff]  }
 0x105   :  { %3513 = vmatprep.subr.bf16.mxu1 %v4773_v11 }
 0x107   :  { %3473 = vmatpush2.bf16.msra.mxu0 %v4768_v12 }
 0x108   :  { %3514 = vmatpush2.bf16.msra.mxu1 %v4771_v13  ;;  %3474 = vmatprep.subr.bf16.mxu0 %v4776_v14  ;;  %v4834_v14 = vld [vmem:[#allocation5 + $0xac] ss:$16 sps:$4 sm:$0xff]  }
 0x109   :  { %3515 = vmatprep.subr.bf16.mxu1 %v4779_v15  ;;  %v4837_v15 = vld [vmem:[#allocation5 + $0x2ac] ss:$16 sps:$4 sm:$0xff]  }
 0x10b   :  { %3475 = vmatpush2.bf16.msra.mxu0 %v4774_v18 }
 0x10c   :  { %3516 = vmatpush2.bf16.msra.mxu1 %v4777_v19  ;;  %3476 = vmatprep.subr.bf16.mxu0 %v4782_v20 }
 0x10d   :  { %3517 = vmatprep.subr.bf16.mxu1 %v4785_v21 }
 0x10f   :  { %3477 = vmatpush2.bf16.msra.mxu0 %v4780_v26  ;;  %v4832_v26 = vld [vmem:[#allocation5 + $0xa8] ss:$16 sps:$4 sm:$0xff]  }
 0x110   :  { %3518 = vmatpush2.bf16.msra.mxu1 %v4783_v27  ;;  %3478 = vmatprep.subr.bf16.mxu0 %v4788_v28  ;;  %v4835_v28 = vld [vmem:[#allocation5 + $0x2a8] ss:$16 sps:$4 sm:$0xff]  }
 0x111   :  { %3519 = vmatprep.subr.bf16.mxu1 %v4791_v29 }
 0x113   :  { %3479 = vmatpush2.bf16.msra.mxu0 %v4786_v30 }
 0x114   :  { %3520 = vmatpush2.bf16.msra.mxu1 %v4789_v31  ;;  %3480 = vmatprep.subr.bf16.mxu0 %v4794_v32  ;;  %v4840_v31 = vld [vmem:[#allocation5 + $0x8c] ss:$16 sps:$4 sm:$0xff]  }
 0x115   :  { %3521 = vmatprep.subr.bf16.mxu1 %v4797_v33  ;;  %v4843_v32 = vld [vmem:[#allocation5 + $0x28c] ss:$16 sps:$4 sm:$0xff]   ;;  %v4838_v33 = vld [vmem:[#allocation5 + $0x88] ss:$16 sps:$4 sm:$0xff]  }
 0x117   :  { %3481 = vmatpush2.bf16.msra.mxu0 %v4792_v34  ;;  %v4849_v34 = vld [vmem:[#allocation5 + $0x26c] ss:$16 sps:$4 sm:$0xff]  }
 0x118   :  { %3522 = vmatpush2.bf16.msra.mxu1 %v4795_v41  ;;  %3482 = vmatprep.subr.bf16.mxu0 %v4800_v42  ;;  %v4844_v41 = vld [vmem:[#allocation5 + $0x68] ss:$16 sps:$4 sm:$0xff]  }
 0x119   :  { %3523 = vmatprep.subr.bf16.mxu1 %v4803_v43  ;;  %v4847_v42 = vld [vmem:[#allocation5 + $0x268] ss:$16 sps:$4 sm:$0xff]   ;;  %v4852_v43 = vld [vmem:[#allocation5 + $0x4c] ss:$16 sps:$4 sm:$0xff]  }
 0x11b   :  { %3483 = vmatpush2.bf16.msra.mxu0 %v4798_v23  ;;  %v4855_v23 = vld [vmem:[#allocation5 + $0x24c] ss:$16 sps:$4 sm:$0xff]  }
 0x11c   :  { %3524 = vmatpush2.bf16.msra.mxu1 %v4801_v45  ;;  %3484 = vmatprep.subr.bf16.mxu0 %v4806_v48  ;;  %v4850_v45 = vld [vmem:[#allocation5 + $0x48] ss:$16 sps:$4 sm:$0xff]   ;;  %v4858_v48 = vld [vmem:[#allocation5 + $0x2c] ss:$16 sps:$4 sm:$0xff]  }
 0x11d   :  { %3525 = vmatprep.subr.bf16.mxu1 %v4809_v49  ;;  %v4861_v49 = vld [vmem:[#allocation5 + $0x22c] ss:$16 sps:$4 sm:$0xff]  }
 0x11f   :  { %3485 = vmatpush2.bf16.msra.mxu0 %v4804_v50  ;;  %v4856_v50 = vld [vmem:[#allocation5 + $0x28] ss:$16 sps:$4 sm:$0xff]  }
 0x120   :  { %3526 = vmatpush2.bf16.msra.mxu1 %v4807_v52  ;;  %3486 = vmatprep.subr.bf16.mxu0 %v4812_v54  ;;  %v4859_v52 = vld [vmem:[#allocation5 + $0x228] ss:$16 sps:$4 sm:$0xff]   ;;  %v4864_v54 = vld [vmem:[#allocation5 + $0xc] ss:$16 sps:$4 sm:$0xff]  }
 0x121   :  { %3527 = vmatprep.subr.bf16.mxu1 %v4815_v55  ;;  %v4867_v55 = vld [vmem:[#allocation5 + $0x20c] ss:$16 sps:$4 sm:$0xff]  }
 0x123   :  { %3487 = vmatpush2.bf16.msra.mxu0 %v4810_v56  ;;  %v4862_v56 = vld [vmem:[#allocation5 + $0x8] ss:$16 sps:$4 sm:$0xff]  }
 0x124   :  { %3528 = vmatpush2.bf16.msra.mxu1 %v4813_v57  ;;  %3538 = vmatprep.subr.bf16.mxu0 %v4822_v60  ;;  %v4865_v57 = vld [vmem:[#allocation5 + $0x208] ss:$16 sps:$4 sm:$0xff]  }
 0x125   :  { %3579 = vmatprep.subr.bf16.mxu1 %v4825_v61  ;;  %v4868_v60 = vld [vmem:[#allocation5 + $0x1e8] ss:$16 sps:$4 sm:$0xff]  }
 0x126   :  { %v3244_v9 = vpop.f32.mrf.mxu0  ;;  %3489 = vmatmul.mubr.bf16.vlgmr.msra.gmra.mxu0 %v5406_v63  ;;  %v4871_v61 = vld [vmem:[#allocation5 + $0x3e8] ss:$16 sps:$4 sm:$0xff]  }
 0x127   :  { %v3285_v10 = vpop.f32.mrf.mxu1  ;;  %3530 = vmatmul.mubr.bf16.vlgmr.msra.gmra.mxu1 %v5410_v0  ;;  %v3245_v11 = vadd.f32 %v3244_v9, %v577_v2  ;;  %3539 = vmatpush1.bf16.msra.mxu0 %v4820_v1  ;;  %v4879_v1 = vld [vmem:[#allocation5 + $0x3cc] ss:$16 sps:$4 sm:$0xff]   ;;  %v4874_v2 = vld [vmem:[#allocation5 + $0x1c8] ss:$16 sps:$4 sm:$0xff]  }
 0x128   :  { %3580 = vmatpush1.bf16.msra.mxu1 %v4823_v3  ;;  %v3246_v12 = vpop.f32.mrf.mxu0  ;;  %3540 = vmatprep.subr.bf16.mxu0 %v4828_v4  ;;  %v4877_v3 = vld [vmem:[#allocation5 + $0x3c8] ss:$16 sps:$4 sm:$0xff]   ;;  %v4882_v4 = vld [vmem:[#allocation5 + $0x1ac] ss:$16 sps:$4 sm:$0xff]  }
 0x129   :  { %v3287_v13 = vpop.f32.mrf.mxu1  ;;  %3581 = vmatprep.subr.bf16.mxu1 %v4831_v5  ;;  %v5414_v18 = vadd.f32 %v3285_v10, %v3245_v11  ;;  %v3247_v19 = vadd.f32 %v3246_v12, %v581_v8  ;;  %3570 = vmatprep.mubr.bf16.mxu0 %v5326_v47  ;;  %v4841_v47 = vld [vmem:[#allocation5 + $0x288] ss:$16 sps:$4 sm:$0xff]   ;;  %v4885_v5 = vld [vmem:[#allocation5 + $0x3ac] ss:$16 sps:$4 sm:$0xff]  }
 0x12a   :  { %3611 = vmatprep.mubr.bf16.mxu1 %v5328_v51  ;;  %v3248_v20 = vpop.f32.mrf.mxu0  ;;  %v4846_v51 = vld [vmem:[#allocation5 + $0x6c] ss:$16 sps:$4 sm:$0xff]   ;;  %v4880_v8 = vld [vmem:[#allocation5 + $0x1a8] ss:$16 sps:$4 sm:$0xff]  }
 0x12b   :  { %v3289_v21 = vpop.f32.mrf.mxu1  ;;  %v5418_v27 = vadd.f32 %v3287_v13, %v3247_v19  ;;  %3541 = vmatpush1.bf16.msra.mxu0 %v4826_v35  ;;  %v4883_v9 = vld [vmem:[#allocation5 + $0x3a8] ss:$16 sps:$4 sm:$0xff]   ;;  %v4888_v10 = vld [vmem:[#allocation5 + $0x18c] ss:$16 sps:$4 sm:$0xff]  }
 0x12c   :  { %3582 = vmatpush1.bf16.msra.mxu1 %v4829_v40  ;;  %v3249_v29 = vpop.f32.mrf.mxu0  ;;  %3542 = vmatprep.subr.bf16.mxu0 %v4834_v14  ;;  %v4891_v35 = vld [vmem:[#allocation5 + $0x38c] ss:$16 sps:$4 sm:$0xff]   ;;  %v4886_v11 = vld [vmem:[#allocation5 + $0x188] ss:$16 sps:$4 sm:$0xff]  }
 0x12d   :  { %v3290_v30 = vpop.f32.mrf.mxu1  ;;  %3583 = vmatprep.subr.bf16.mxu1 %v4837_v15  ;;  %v4889_v40 = vld [vmem:[#allocation5 + $0x388] ss:$16 sps:$4 sm:$0xff]   ;;  %v4894_v12 = vld [vmem:[#allocation5 + $0x16c] ss:$16 sps:$4 sm:$0xff]  }
 0x12e   :  { %v4897_v13 = vld [vmem:[#allocation5 + $0x36c] ss:$16 sps:$4 sm:$0xff]   ;;  %v4892_v14 = vld [vmem:[#allocation5 + $0x168] ss:$16 sps:$4 sm:$0xff]  }
 0x12f   :  { %3543 = vmatpush1.bf16.msra.mxu0 %v4832_v26  ;;  %v4895_v15 = vld [vmem:[#allocation5 + $0x368] ss:$16 sps:$4 sm:$0xff]   ;;  %v4900_v19 = vld [vmem:[#allocation5 + $0x14c] ss:$16 sps:$4 sm:$0xff]  }
 0x130   :  { %3584 = vmatpush1.bf16.msra.mxu1 %v4835_v28  ;;  %3544 = vmatprep.subr.bf16.mxu0 %v4840_v31  ;;  %v4903_v20 = vld [vmem:[#allocation5 + $0x34c] ss:$16 sps:$4 sm:$0xff]   ;;  %v4898_v21 = vld [vmem:[#allocation5 + $0x148] ss:$16 sps:$4 sm:$0xff]  }
 0x131   :  { %3585 = vmatprep.subr.bf16.mxu1 %v4843_v32  ;;  %v4901_v26 = vld [vmem:[#allocation5 + $0x348] ss:$16 sps:$4 sm:$0xff]   ;;  %v4906_v28 = vld [vmem:[#allocation5 + $0x12c] ss:$16 sps:$4 sm:$0xff]  }
 0x132   :  { %v4909_v29 = vld [vmem:[#allocation5 + $0x32c] ss:$16 sps:$4 sm:$0xff]   ;;  %v4904_v30 = vld [vmem:[#allocation5 + $0x128] ss:$16 sps:$4 sm:$0xff]  }
 0x133   :  { %3545 = vmatpush1.bf16.msra.mxu0 %v4838_v33  ;;  %v4907_v31 = vld [vmem:[#allocation5 + $0x328] ss:$16 sps:$4 sm:$0xff]   ;;  %v4912_v32 = vld [vmem:[#allocation5 + $0x10c] ss:$16 sps:$4 sm:$0xff]  }
 0x134   :  { %3586 = vmatpush1.bf16.msra.mxu1 %v4841_v47  ;;  %3546 = vmatprep.subr.bf16.mxu0 %v4846_v51  ;;  %v4915_v33 = vld [vmem:[#allocation5 + $0x30c] ss:$16 sps:$4 sm:$0xff]   ;;  %v4910_v47 = vld [vmem:[#allocation5 + $0x108] ss:$16 sps:$4 sm:$0xff]  }
 0x135   :  { %3587 = vmatprep.subr.bf16.mxu1 %v4849_v34  ;;  %v4913_v51 = vld [vmem:[#allocation5 + $0x308] ss:$16 sps:$4 sm:$0xff]   ;;  %v4918_v34 = vld [vmem:[#allocation5 + $0x4ec] ss:$16 sps:$4 sm:$0xff]  }
 0x137   :  { %3547 = vmatpush1.bf16.msra.mxu0 %v4844_v41  ;;  %v4921_v41 = vld [vmem:[#allocation5 + $0x6ec] ss:$16 sps:$4 sm:$0xff]  }
 0x138   :  { %3588 = vmatpush1.bf16.msra.mxu1 %v4847_v42  ;;  %3548 = vmatprep.subr.bf16.mxu0 %v4852_v43  ;;  %v4916_v42 = vld [vmem:[#allocation5 + $0x4e8] ss:$16 sps:$4 sm:$0xff]  }
 0x139   :  { %3589 = vmatprep.subr.bf16.mxu1 %v4855_v23  ;;  %v4919_v43 = vld [vmem:[#allocation5 + $0x6e8] ss:$16 sps:$4 sm:$0xff]   ;;  %v4924_v23 = vld [vmem:[#allocation5 + $0x4cc] ss:$16 sps:$4 sm:$0xff]  }
 0x13b   :  { %3549 = vmatpush1.bf16.msra.mxu0 %v4850_v45  ;;  %v4927_v45 = vld [vmem:[#allocation5 + $0x6cc] ss:$16 sps:$4 sm:$0xff]  }
 0x13c   :  { %3590 = vmatpush1.bf16.msra.mxu1 %v4853_v46  ;;  %3550 = vmatprep.subr.bf16.mxu0 %v4858_v48 }
 0x13d   :  { %3591 = vmatprep.subr.bf16.mxu1 %v4861_v49 }
 0x13f   :  { %3551 = vmatpush1.bf16.msra.mxu0 %v4856_v50  ;;  %v4922_v50 = vld [vmem:[#allocation5 + $0x4c8] ss:$16 sps:$4 sm:$0xff]  }
 0x140   :  { %3592 = vmatpush1.bf16.msra.mxu1 %v4859_v52  ;;  %3552 = vmatprep.subr.bf16.mxu0 %v4864_v54  ;;  %v4925_v52 = vld [vmem:[#allocation5 + $0x6c8] ss:$16 sps:$4 sm:$0xff]  }
 0x141   :  { %3593 = vmatprep.subr.bf16.mxu1 %v4867_v55 }
 0x143   :  { %3553 = vmatpush1.bf16.msra.mxu0 %v4862_v56  ;;  %v4930_v56 = vld [vmem:[#allocation5 + $0x4ac] ss:$16 sps:$4 sm:$0xff]  }
 0x144   :  { %3594 = vmatpush1.bf16.msra.mxu1 %v4865_v57  ;;  %3554 = vmatprep.subr.bf16.mxu0 %v4870_v58  ;;  %v4933_v57 = vld [vmem:[#allocation5 + $0x6ac] ss:$16 sps:$4 sm:$0xff]  }
 0x145   :  { %3595 = vmatprep.subr.bf16.mxu1 %v4873_v59 }
 0x147   :  { %3555 = vmatpush2.bf16.msra.mxu0 %v4868_v60  ;;  %v4928_v60 = vld [vmem:[#allocation5 + $0x4a8] ss:$16 sps:$4 sm:$0xff]  }
 0x148   :  { %3596 = vmatpush2.bf16.msra.mxu1 %v4871_v61  ;;  %3556 = vmatprep.subr.bf16.mxu0 %v4876_v62  ;;  %v4931_v61 = vld [vmem:[#allocation5 + $0x6a8] ss:$16 sps:$4 sm:$0xff]  }
 0x149   :  { %3597 = vmatprep.subr.bf16.mxu1 %v4879_v1 }
 0x14b   :  { %3557 = vmatpush2.bf16.msra.mxu0 %v4874_v2  ;;  %v4936_v2 = vld [vmem:[#allocation5 + $0x48c] ss:$16 sps:$4 sm:$0xff]  }
 0x14c   :  { %3598 = vmatpush2.bf16.msra.mxu1 %v4877_v3  ;;  %3558 = vmatprep.subr.bf16.mxu0 %v4882_v4  ;;  %v4939_v3 = vld [vmem:[#allocation5 + $0x68c] ss:$16 sps:$4 sm:$0xff]  }
 0x14d   :  { %3599 = vmatprep.subr.bf16.mxu1 %v4885_v5  ;;  %v4945_v4 = vld [vmem:[#allocation5 + $0x66c] ss:$16 sps:$4 sm:$0xff]   ;;  %v4940_v5 = vld [vmem:[#allocation5 + $0x468] ss:$16 sps:$4 sm:$0xff]  }
 0x14f   :  { %3559 = vmatpush2.bf16.msra.mxu0 %v4880_v8  ;;  %v4943_v8 = vld [vmem:[#allocation5 + $0x668] ss:$16 sps:$4 sm:$0xff]  }
 0x150   :  { %3600 = vmatpush2.bf16.msra.mxu1 %v4883_v9  ;;  %3560 = vmatprep.subr.bf16.mxu0 %v4888_v10  ;;  %v4948_v9 = vld [vmem:[#allocation5 + $0x44c] ss:$16 sps:$4 sm:$0xff]  }
 0x151   :  { %3601 = vmatprep.subr.bf16.mxu1 %v4891_v35  ;;  %v4951_v10 = vld [vmem:[#allocation5 + $0x64c] ss:$16 sps:$4 sm:$0xff]   ;;  %v4946_v35 = vld [vmem:[#allocation5 + $0x448] ss:$16 sps:$4 sm:$0xff]  }
 0x153   :  { %3561 = vmatpush2.bf16.msra.mxu0 %v4886_v11  ;;  %v4949_v11 = vld [vmem:[#allocation5 + $0x648] ss:$16 sps:$4 sm:$0xff]  }
 0x154   :  { %3602 = vmatpush2.bf16.msra.mxu1 %v4889_v40  ;;  %3562 = vmatprep.subr.bf16.mxu0 %v4894_v12  ;;  %v4954_v40 = vld [vmem:[#allocation5 + $0x42c] ss:$16 sps:$4 sm:$0xff]  }
 0x155   :  { %3603 = vmatprep.subr.bf16.mxu1 %v4897_v13  ;;  %v4957_v12 = vld [vmem:[#allocation5 + $0x62c] ss:$16 sps:$4 sm:$0xff]   ;;  %v4952_v13 = vld [vmem:[#allocation5 + $0x428] ss:$16 sps:$4 sm:$0xff]  }
 0x157   :  { %3563 = vmatpush2.bf16.msra.mxu0 %v4892_v14  ;;  %v4955_v14 = vld [vmem:[#allocation5 + $0x628] ss:$16 sps:$4 sm:$0xff]  }
 0x158   :  { %3604 = vmatpush2.bf16.msra.mxu1 %v4895_v15  ;;  %3564 = vmatprep.subr.bf16.mxu0 %v4900_v19  ;;  %v4960_v15 = vld [vmem:[#allocation5 + $0x40c] ss:$16 sps:$4 sm:$0xff]  }
 0x159   :  { %3605 = vmatprep.subr.bf16.mxu1 %v4903_v20  ;;  %v4963_v19 = vld [vmem:[#allocation5 + $0x60c] ss:$16 sps:$4 sm:$0xff]   ;;  %v4958_v20 = vld [vmem:[#allocation5 + $0x408] ss:$16 sps:$4 sm:$0xff]  }
 0x15b   :  { %3565 = vmatpush2.bf16.msra.mxu0 %v4898_v21  ;;  %v4961_v21 = vld [vmem:[#allocation5 + $0x608] ss:$16 sps:$4 sm:$0xff]  }
 0x15c   :  { %3606 = vmatpush2.bf16.msra.mxu1 %v4901_v26  ;;  %3566 = vmatprep.subr.bf16.mxu0 %v4906_v28  ;;  %v4966_v26 = vld [vmem:[#allocation5 + $0x5ec] ss:$16 sps:$4 sm:$0xff]  }
 0x15d   :  { %3607 = vmatprep.subr.bf16.mxu1 %v4909_v29  ;;  %v4969_v28 = vld [vmem:[#allocation5 + $0x7ec] ss:$16 sps:$4 sm:$0xff]   ;;  %v4964_v29 = vld [vmem:[#allocation5 + $0x5e8] ss:$16 sps:$4 sm:$0xff]  }
 0x15f   :  { %3567 = vmatpush2.bf16.msra.mxu0 %v4904_v30  ;;  %v4967_v30 = vld [vmem:[#allocation5 + $0x7e8] ss:$16 sps:$4 sm:$0xff]  }
 0x160   :  { %3608 = vmatpush2.bf16.msra.mxu1 %v4907_v31  ;;  %3568 = vmatprep.subr.bf16.mxu0 %v4912_v32  ;;  %v4972_v31 = vld [vmem:[#allocation5 + $0x5cc] ss:$16 sps:$4 sm:$0xff]  }
 0x161   :  { %3609 = vmatprep.subr.bf16.mxu1 %v4915_v33  ;;  %v4975_v32 = vld [vmem:[#allocation5 + $0x7cc] ss:$16 sps:$4 sm:$0xff]   ;;  %v4970_v33 = vld [vmem:[#allocation5 + $0x5c8] ss:$16 sps:$4 sm:$0xff]  }
 0x163   :  { %3569 = vmatpush2.bf16.msra.mxu0 %v4910_v47  ;;  %v4973_v47 = vld [vmem:[#allocation5 + $0x7c8] ss:$16 sps:$4 sm:$0xff]  }
 0x164   :  { %3610 = vmatpush2.bf16.msra.mxu1 %v4913_v51  ;;  %3620 = vmatprep.subr.bf16.mxu0 %v4918_v34  ;;  %v4978_v51 = vld [vmem:[#allocation5 + $0x5ac] ss:$16 sps:$4 sm:$0xff]  }
 0x165   :  { %3661 = vmatprep.subr.bf16.mxu1 %v4921_v41  ;;  %v4981_v34 = vld [vmem:[#allocation5 + $0x7ac] ss:$16 sps:$4 sm:$0xff]   ;;  %v4976_v41 = vld [vmem:[#allocation5 + $0x5a8] ss:$16 sps:$4 sm:$0xff]  }
 0x166   :  { %v3326_v46 = vpop.f32.mrf.mxu0  ;;  %3571 = vmatmul.mubr.bf16.vlgmr.msra.gmra.mxu0 %v5332_v6 }
 0x167   :  { %v3367_v48 = vpop.f32.mrf.mxu1  ;;  %3612 = vmatmul.mubr.bf16.vlgmr.msra.gmra.mxu1 %v5334_v7  ;;  %v3327_v49 = vadd.f32 %v3326_v46, %v5414_v18  ;;  %3621 = vmatpush1.bf16.msra.mxu0 %v4916_v42  ;;  %v4979_v42 = vld [vmem:[#allocation5 + $0x7a8] ss:$16 sps:$4 sm:$0xff]  }
 0x168   :  { %3662 = vmatpush1.bf16.msra.mxu1 %v4919_v43  ;;  %v3328_v54 = vpop.f32.mrf.mxu0  ;;  %3622 = vmatprep.subr.bf16.mxu0 %v4924_v23  ;;  %v4984_v43 = vld [vmem:[#allocation5 + $0x58c] ss:$16 sps:$4 sm:$0xff]   ;;  %v4985_v46 = vld [vmem:[#allocation5 + $0x788] ss:$16 sps:$4 sm:$0xff]  }
 0x169   :  { %v3369_v55 = vpop.f32.mrf.mxu1  ;;  %3663 = vmatprep.subr.bf16.mxu1 %v4927_v45  ;;  %v5423_v58 = vadd.f32 %v3367_v48, %v3327_v49  ;;  %v3329_v59 = vadd.f32 %v3328_v54, %v5418_v27  ;;  %3652 = vmatprep.mubr.bf16.mxu0 %v5344_v36  ;;  %v4934_v27 = vld [vmem:[#allocation5 + $0x488] ss:$16 sps:$4 sm:$0xff]   ;;  %v4987_v23 = vld [vmem:[#allocation5 + $0x78c] ss:$16 sps:$4 sm:$0xff]  }
 0x16a   :  { %3693 = vmatprep.mubr.bf16.mxu1 %v5348_v37  ;;  %v3330_v6 = vpop.f32.mrf.mxu0  ;;  %v4937_v36 = vld [vmem:[#allocation5 + $0x688] ss:$16 sps:$4 sm:$0xff]   ;;  %v4942_v37 = vld [vmem:[#allocation5 + $0x46c] ss:$16 sps:$4 sm:$0xff]  }
 0x16b   :  { %v3371_v7 = vpop.f32.mrf.mxu1  ;;  %v5428_v18 = vadd.f32 %v3369_v55, %v3329_v59  ;;  %3623 = vmatpush1.bf16.msra.mxu0 %v4922_v50  ;;  %v4982_v45 = vld [vmem:[#allocation5 + $0x588] ss:$16 sps:$4 sm:$0xff]   ;;  %v4990_v48 = vld [vmem:[#allocation5 + $0x56c] ss:$16 sps:$4 sm:$0xff]  }
 0x16c   :  { %3664 = vmatpush1.bf16.msra.mxu1 %v4925_v52  ;;  %v3331_v62 = vpop.f32.mrf.mxu0  ;;  %3624 = vmatprep.subr.bf16.mxu0 %v4930_v56  ;;  %v4993_v49 = vld [vmem:[#allocation5 + $0x76c] ss:$16 sps:$4 sm:$0xff]   ;;  %v4988_v50 = vld [vmem:[#allocation5 + $0x568] ss:$16 sps:$4 sm:$0xff]  }
 0x16d   :  { %v3372_v1 = vpop.f32.mrf.mxu1  ;;  %3665 = vmatprep.subr.bf16.mxu1 %v4933_v57  ;;  %v4991_v52 = vld [vmem:[#allocation5 + $0x768] ss:$16 sps:$4 sm:$0xff]   ;;  %v4996_v54 = vld [vmem:[#allocation5 + $0x54c] ss:$16 sps:$4 sm:$0xff]  }
 0x16e   :  { %v4999_v55 = vld [vmem:[#allocation5 + $0x74c] ss:$16 sps:$4 sm:$0xff]   ;;  %v4994_v56 = vld [vmem:[#allocation5 + $0x548] ss:$16 sps:$4 sm:$0xff]  }
 0x16f   :  { %3625 = vmatpush1.bf16.msra.mxu0 %v4928_v60  ;;  %v4997_v57 = vld [vmem:[#allocation5 + $0x748] ss:$16 sps:$4 sm:$0xff]   ;;  %v5002_v59 = vld [vmem:[#allocation5 + $0x52c] ss:$16 sps:$4 sm:$0xff]  }
 0x170   :  { %3666 = vmatpush1.bf16.msra.mxu1 %v4931_v61  ;;  %3626 = vmatprep.subr.bf16.mxu0 %v4936_v2  ;;  %v5005_v6 = vld [vmem:[#allocation5 + $0x72c] ss:$16 sps:$4 sm:$0xff]   ;;  %v5000_v7 = vld [vmem:[#allocation5 + $0x528] ss:$16 sps:$4 sm:$0xff]  }
 0x171   :  { %3667 = vmatprep.subr.bf16.mxu1 %v4939_v3  ;;  %v5003_v60 = vld [vmem:[#allocation5 + $0x728] ss:$16 sps:$4 sm:$0xff]   ;;  %v5008_v61 = vld [vmem:[#allocation5 + $0x50c] ss:$16 sps:$4 sm:$0xff]  }
 0x172   :  { %v5011_v62 = vld [vmem:[#allocation5 + $0x70c] ss:$16 sps:$4 sm:$0xff]   ;;  %v5006_v1 = vld [vmem:[#allocation5 + $0x508] ss:$16 sps:$4 sm:$0xff]  }
 0x173   :  { %3627 = vmatpush1.bf16.msra.mxu0 %v4934_v27  ;;  %v5009_v2 = vld [vmem:[#allocation5 + $0x708] ss:$16 sps:$4 sm:$0xff]   ;;  %v5014_v3 = vld [vmem:[#allocation5 + $0x8ec] ss:$16 sps:$4 sm:$0xff]  }
 0x174   :  { %3668 = vmatpush1.bf16.msra.mxu1 %v4937_v36  ;;  %3628 = vmatprep.subr.bf16.mxu0 %v4942_v37  ;;  %v5017_v27 = vld [vmem:[#allocation5 + $0xaec] ss:$16 sps:$4 sm:$0xff]   ;;  %v5012_v36 = vld [vmem:[#allocation5 + $0x8e8] ss:$16 sps:$4 sm:$0xff]  }
 0x175   :  { %3669 = vmatprep.subr.bf16.mxu1 %v4945_v4  ;;  %v5015_v37 = vld [vmem:[#allocation5 + $0xae8] ss:$16 sps:$4 sm:$0xff]   ;;  %v5020_v4 = vld [vmem:[#allocation5 + $0x8cc] ss:$16 sps:$4 sm:$0xff]  }
 0x177   :  { %3629 = vmatpush1.bf16.msra.mxu0 %v4940_v5  ;;  %v5023_v5 = vld [vmem:[#allocation5 + $0xacc] ss:$16 sps:$4 sm:$0xff]  }
 0x178   :  { %3670 = vmatpush1.bf16.msra.mxu1 %v4943_v8  ;;  %3630 = vmatprep.subr.bf16.mxu0 %v4948_v9 }
 0x179   :  { %3671 = vmatprep.subr.bf16.mxu1 %v4951_v10  ;;  %v5018_v10 = vld [vmem:[#allocation5 + $0x8c8] ss:$16 sps:$4 sm:$0xff]  }
 0x17b   :  { %3631 = vmatpush1.bf16.msra.mxu0 %v4946_v35  ;;  %v5021_v35 = vld [vmem:[#allocation5 + $0xac8] ss:$16 sps:$4 sm:$0xff]  }
 0x17c   :  { %3672 = vmatpush1.bf16.msra.mxu1 %v4949_v11  ;;  %3632 = vmatprep.subr.bf16.mxu0 %v4954_v40 }
 0x17d   :  { %3673 = vmatprep.subr.bf16.mxu1 %v4957_v12  ;;  %v5026_v12 = vld [vmem:[#allocation5 + $0x8ac] ss:$16 sps:$4 sm:$0xff]  }
 0x17f   :  { %3633 = vmatpush1.bf16.msra.mxu0 %v4952_v13  ;;  %v5029_v13 = vld [vmem:[#allocation5 + $0xaac] ss:$16 sps:$4 sm:$0xff]  }
 0x180   :  { %3674 = vmatpush1.bf16.msra.mxu1 %v4955_v14  ;;  %3634 = vmatprep.subr.bf16.mxu0 %v4960_v15  ;;  %v5027_v15 = vld [vmem:[#allocation5 + $0xaa8] ss:$16 sps:$4 sm:$0xff]  }
 0x181   :  { %3675 = vmatprep.subr.bf16.mxu1 %v4963_v19 }
 0x183   :  { %3635 = vmatpush1.bf16.msra.mxu0 %v4958_v20 }
 0x184   :  { %3676 = vmatpush1.bf16.msra.mxu1 %v4961_v21  ;;  %3636 = vmatprep.subr.bf16.mxu0 %v4966_v26  ;;  %v5032_v21 = vld [vmem:[#allocation5 + $0x88c] ss:$16 sps:$4 sm:$0xff]  }
 0x185   :  { %3677 = vmatprep.subr.bf16.mxu1 %v4969_v28  ;;  %v5035_v26 = vld [vmem:[#allocation5 + $0xa8c] ss:$16 sps:$4 sm:$0xff]   ;;  %v5030_v28 = vld [vmem:[#allocation5 + $0x888] ss:$16 sps:$4 sm:$0xff]  }
 0x187   :  { %3637 = vmatpush2.bf16.msra.mxu0 %v4964_v29  ;;  %v5033_v29 = vld [vmem:[#allocation5 + $0xa88] ss:$16 sps:$4 sm:$0xff]  }
 0x188   :  { %3678 = vmatpush2.bf16.msra.mxu1 %v4967_v30  ;;  %3638 = vmatprep.subr.bf16.mxu0 %v4972_v31  ;;  %v5036_v30 = vld [vmem:[#allocation5 + $0x868] ss:$16 sps:$4 sm:$0xff]  }
 0x189   :  { %3679 = vmatprep.subr.bf16.mxu1 %v4975_v32  ;;  %v5039_v31 = vld [vmem:[#allocation5 + $0xa68] ss:$16 sps:$4 sm:$0xff]   ;;  %v5044_v32 = vld [vmem:[#allocation5 + $0x84c] ss:$16 sps:$4 sm:$0xff]  }
 0x18b   :  { %3639 = vmatpush2.bf16.msra.mxu0 %v4970_v33  ;;  %v5047_v33 = vld [vmem:[#allocation5 + $0xa4c] ss:$16 sps:$4 sm:$0xff]  }
 0x18c   :  { %3680 = vmatpush2.bf16.msra.mxu1 %v4973_v47  ;;  %3640 = vmatprep.subr.bf16.mxu0 %v4978_v51  ;;  %v5042_v47 = vld [vmem:[#allocation5 + $0x848] ss:$16 sps:$4 sm:$0xff]  }
 0x18d   :  { %3681 = vmatprep.subr.bf16.mxu1 %v4981_v34  ;;  %v5045_v51 = vld [vmem:[#allocation5 + $0xa48] ss:$16 sps:$4 sm:$0xff]   ;;  %v5050_v34 = vld [vmem:[#allocation5 + $0x82c] ss:$16 sps:$4 sm:$0xff]  }
 0x18f   :  { %3641 = vmatpush2.bf16.msra.mxu0 %v4976_v41  ;;  %v5053_v41 = vld [vmem:[#allocation5 + $0xa2c] ss:$16 sps:$4 sm:$0xff]  }
 0x190   :  { %3682 = vmatpush2.bf16.msra.mxu1 %v4979_v42  ;;  %3642 = vmatprep.subr.bf16.mxu0 %v4984_v43  ;;  %v5048_v42 = vld [vmem:[#allocation5 + $0x828] ss:$16 sps:$4 sm:$0xff]  }
 0x191   :  { %3683 = vmatprep.subr.bf16.mxu1 %v4987_v23  ;;  %v5051_v43 = vld [vmem:[#allocation5 + $0xa28] ss:$16 sps:$4 sm:$0xff]   ;;  %v5056_v23 = vld [vmem:[#allocation5 + $0x80c] ss:$16 sps:$4 sm:$0xff]  }
 0x193   :  { %3643 = vmatpush2.bf16.msra.mxu0 %v4982_v45  ;;  %v5059_v45 = vld [vmem:[#allocation5 + $0xa0c] ss:$16 sps:$4 sm:$0xff]  }
 0x194   :  { %3684 = vmatpush2.bf16.msra.mxu1 %v4985_v46  ;;  %3644 = vmatprep.subr.bf16.mxu0 %v4990_v48  ;;  %v5054_v46 = vld [vmem:[#allocation5 + $0x808] ss:$16 sps:$4 sm:$0xff]  }
 0x195   :  { %3685 = vmatprep.subr.bf16.mxu1 %v4993_v49  ;;  %v5057_v48 = vld [vmem:[#allocation5 + $0xa08] ss:$16 sps:$4 sm:$0xff]   ;;  %v5062_v49 = vld [vmem:[#allocation5 + $0x9ec] ss:$16 sps:$4 sm:$0xff]  }
 0x197   :  { %3645 = vmatpush2.bf16.msra.mxu0 %v4988_v50  ;;  %v5065_v50 = vld [vmem:[#allocation5 + $0xbec] ss:$16 sps:$4 sm:$0xff]  }
 0x198   :  { %3686 = vmatpush2.bf16.msra.mxu1 %v4991_v52  ;;  %3646 = vmatprep.subr.bf16.mxu0 %v4996_v54  ;;  %v5060_v52 = vld [vmem:[#allocation5 + $0x9e8] ss:$16 sps:$4 sm:$0xff]  }
 0x199   :  { %3687 = vmatprep.subr.bf16.mxu1 %v4999_v55  ;;  %v5063_v54 = vld [vmem:[#allocation5 + $0xbe8] ss:$16 sps:$4 sm:$0xff]   ;;  %v5068_v55 = vld [vmem:[#allocation5 + $0x9cc] ss:$16 sps:$4 sm:$0xff]  }
 0x19b   :  { %3647 = vmatpush2.bf16.msra.mxu0 %v4994_v56  ;;  %v5071_v56 = vld [vmem:[#allocation5 + $0xbcc] ss:$16 sps:$4 sm:$0xff]  }
 0x19c   :  { %3688 = vmatpush2.bf16.msra.mxu1 %v4997_v57  ;;  %3648 = vmatprep.subr.bf16.mxu0 %v5002_v59  ;;  %v5066_v57 = vld [vmem:[#allocation5 + $0x9c8] ss:$16 sps:$4 sm:$0xff]  }
 0x19d   :  { %3689 = vmatprep.subr.bf16.mxu1 %v5005_v6  ;;  %v5069_v59 = vld [vmem:[#allocation5 + $0xbc8] ss:$16 sps:$4 sm:$0xff]   ;;  %v5074_v6 = vld [vmem:[#allocation5 + $0x9ac] ss:$16 sps:$4 sm:$0xff]  }
 0x19f   :  { %3649 = vmatpush2.bf16.msra.mxu0 %v5000_v7  ;;  %v5077_v7 = vld [vmem:[#allocation5 + $0xbac] ss:$16 sps:$4 sm:$0xff]  }
 0x1a0   :  { %3690 = vmatpush2.bf16.msra.mxu1 %v5003_v60  ;;  %3650 = vmatprep.subr.bf16.mxu0 %v5008_v61  ;;  %v5072_v60 = vld [vmem:[#allocation5 + $0x9a8] ss:$16 sps:$4 sm:$0xff]  }
 0x1a1   :  { %3691 = vmatprep.subr.bf16.mxu1 %v5011_v62  ;;  %v5075_v61 = vld [vmem:[#allocation5 + $0xba8] ss:$16 sps:$4 sm:$0xff]   ;;  %v5080_v62 = vld [vmem:[#allocation5 + $0x98c] ss:$16 sps:$4 sm:$0xff]  }
 0x1a3   :  { %3651 = vmatpush2.bf16.msra.mxu0 %v5006_v1  ;;  %v5083_v1 = vld [vmem:[#allocation5 + $0xb8c] ss:$16 sps:$4 sm:$0xff]  }
 0x1a4   :  { %3692 = vmatpush2.bf16.msra.mxu1 %v5009_v2  ;;  %3702 = vmatprep.subr.bf16.mxu0 %v5014_v3  ;;  %v5078_v2 = vld [vmem:[#allocation5 + $0x988] ss:$16 sps:$4 sm:$0xff]  }
 0x1a5   :  { %3743 = vmatprep.subr.bf16.mxu1 %v5017_v27  ;;  %v5081_v3 = vld [vmem:[#allocation5 + $0xb88] ss:$16 sps:$4 sm:$0xff]   ;;  %v5086_v27 = vld [vmem:[#allocation5 + $0x96c] ss:$16 sps:$4 sm:$0xff]  }
 0x1a6   :  { %v5430_v8 = vpop.f32.mrf.mxu0  ;;  %3653 = vmatmul.mubr.bf16.vlgmr.msra.gmra.mxu0 %v5354_v16 }
 0x1a7   :  { %v5432_v9 = vpop.f32.mrf.mxu1  ;;  %3694 = vmatmul.mubr.bf16.vlgmr.msra.gmra.mxu1 %v5358_v17  ;;  %3703 = vmatpush1.bf16.msra.mxu0 %v5012_v36  ;;  %v5024_v17 = vld [vmem:[#allocation5 + $0x8a8] ss:$16 sps:$4 sm:$0xff]   ;;  %v5089_v36 = vld [vmem:[#allocation5 + $0xb6c] ss:$16 sps:$4 sm:$0xff]  }
 0x1a8   :  { %3744 = vmatpush1.bf16.msra.mxu1 %v5015_v37  ;;  %v5436_v11 = vpop.f32.mrf.mxu0  ;;  %3704 = vmatprep.subr.bf16.mxu0 %v5020_v4  ;;  %v5084_v37 = vld [vmem:[#allocation5 + $0x968] ss:$16 sps:$4 sm:$0xff]  }
 0x1a9   :  { %v5438_v40 = vpop.f32.mrf.mxu1  ;;  %3745 = vmatprep.subr.bf16.mxu1 %v5023_v5  ;;  %3734 = vmatprep.mubr.bf16.mxu0 %v5366_v24  ;;  %v5038_v24 = vld [vmem:[#allocation5 + $0x86c] ss:$16 sps:$4 sm:$0xff]   ;;  %v5087_v4 = vld [vmem:[#allocation5 + $0xb68] ss:$16 sps:$4 sm:$0xff]  }
 0x1aa   :  { %3775 = vmatprep.mubr.bf16.mxu1 %v5370_v25  ;;  %v3412_v14 = vpop.f32.mrf.mxu0  ;;  %v5041_v25 = vld [vmem:[#allocation5 + $0xa6c] ss:$16 sps:$4 sm:$0xff]  }
 0x1ab   :  { %v3453_v16 = vpop.f32.mrf.mxu1  ;;  %3705 = vmatpush1.bf16.msra.mxu0 %v5018_v10  ;;  %v5092_v5 = vld [vmem:[#allocation5 + $0x94c] ss:$16 sps:$4 sm:$0xff]  }
 0x1ac   :  { %3746 = vmatpush1.bf16.msra.mxu1 %v5021_v35  ;;  %v3413_v19 = vpop.f32.mrf.mxu0  ;;  %3706 = vmatprep.subr.bf16.mxu0 %v5026_v12  ;;  %v5095_v10 = vld [vmem:[#allocation5 + $0xb4c] ss:$16 sps:$4 sm:$0xff]   ;;  %v5090_v35 = vld [vmem:[#allocation5 + $0x948] ss:$16 sps:$4 sm:$0xff]  }
 0x1ad   :  { %v3454_v20 = vpop.f32.mrf.mxu1  ;;  %3747 = vmatprep.subr.bf16.mxu1 %v5029_v13  ;;  %v5093_v12 = vld [vmem:[#allocation5 + $0xb48] ss:$16 sps:$4 sm:$0xff]   ;;  %v5098_v13 = vld [vmem:[#allocation5 + $0x92c] ss:$16 sps:$4 sm:$0xff]  }
 0x1ae   :  { %v5101_v14 = vld [vmem:[#allocation5 + $0xb2c] ss:$16 sps:$4 sm:$0xff]   ;;  %v5096_v16 = vld [vmem:[#allocation5 + $0x928] ss:$16 sps:$4 sm:$0xff]  }
 0x1af   :  { %3707 = vmatpush1.bf16.msra.mxu0 %v5024_v17  ;;  %v5099_v17 = vld [vmem:[#allocation5 + $0xb28] ss:$16 sps:$4 sm:$0xff]   ;;  %v5107_v19 = vld [vmem:[#allocation5 + $0xb0c] ss:$16 sps:$4 sm:$0xff]  }
 0x1b0   :  { %3748 = vmatpush1.bf16.msra.mxu1 %v5027_v15  ;;  %3708 = vmatprep.subr.bf16.mxu0 %v5032_v21  ;;  %v5104_v15 = vld [vmem:[#allocation5 + $0x90c] ss:$16 sps:$4 sm:$0xff]   ;;  %v5102_v20 = vld [vmem:[#allocation5 + $0x908] ss:$16 sps:$4 sm:$0xff]  }
 0x1b1   :  { %3749 = vmatprep.subr.bf16.mxu1 %v5035_v26  ;;  %v5105_v21 = vld [vmem:[#allocation5 + $0xb08] ss:$16 sps:$4 sm:$0xff]   ;;  %v5110_v26 = vld [vmem:[#allocation5 + $0xcec] ss:$16 sps:$4 sm:$0xff]  }
 0x1b3   :  { %3709 = vmatpush1.bf16.msra.mxu0 %v5030_v28  ;;  %v5113_v28 = vld [vmem:[#allocation5 + $0xeec] ss:$16 sps:$4 sm:$0xff]  }
 0x1b4   :  { %3750 = vmatpush1.bf16.msra.mxu1 %v5033_v29  ;;  %3710 = vmatprep.subr.bf16.mxu0 %v5038_v24  ;;  %v3409_v29 = vadd.f32 %v5430_v8, %v5423_v58  ;;  %v3411_v24 = vadd.f32 %v5436_v11, %v5428_v18  ;;  %v5114_v18 = vld [vmem:[#allocation5 + $0xcc8] ss:$16 sps:$4 sm:$0xff]  }
 0x1b5   :  { %3751 = vmatprep.subr.bf16.mxu1 %v5041_v25  ;;  %v5108_v25 = vld [vmem:[#allocation5 + $0xce8] ss:$16 sps:$4 sm:$0xff]  }
 0x1b6   :  { %v3452_v58 = vadd.f32 %v5438_v40, %v3411_v24  ;;  %v5117_v11 = vld [vmem:[#allocation5 + $0xec8] ss:$16 sps:$4 sm:$0xff]   ;;  %v5182_v24 = vld [vmem:[#allocation5 + $0xd6c] ss:$16 sps:$4 sm:$0xff]  }
 0x1b7   :  { %3711 = vmatpush1.bf16.msra.mxu0 %v5036_v30  ;;  %v5111_v30 = vld [vmem:[#allocation5 + $0xee8] ss:$16 sps:$4 sm:$0xff]  }
 0x1b8   :  { %3752 = vmatpush1.bf16.msra.mxu1 %v5039_v31  ;;  %3712 = vmatprep.subr.bf16.mxu0 %v5044_v32  ;;  %v5116_v31 = vld [vmem:[#allocation5 + $0xccc] ss:$16 sps:$4 sm:$0xff]  }
 0x1b9   :  { %3753 = vmatprep.subr.bf16.mxu1 %v5047_v33  ;;  %v5119_v32 = vld [vmem:[#allocation5 + $0xecc] ss:$16 sps:$4 sm:$0xff]   ;;  %v3450_v33 = vadd.f32 %v5432_v9, %v3409_v29  ;;  %v5177_v29 = vld [vmem:[#allocation5 + $0xf88] ss:$16 sps:$4 sm:$0xff]  }
 0x1bb   :  { %3713 = vmatpush1.bf16.msra.mxu0 %v5042_v47 }
 0x1bc   :  { %3754 = vmatpush1.bf16.msra.mxu1 %v5045_v51  ;;  %3714 = vmatprep.subr.bf16.mxu0 %v5050_v34 }
 0x1bd   :  { %3755 = vmatprep.subr.bf16.mxu1 %v5053_v41 }
 0x1bf   :  { %3715 = vmatpush1.bf16.msra.mxu0 %v5048_v42  ;;  %v5122_v42 = vld [vmem:[#allocation5 + $0xcac] ss:$16 sps:$4 sm:$0xff]  }
 0x1c0   :  { %3756 = vmatpush1.bf16.msra.mxu1 %v5051_v43  ;;  %3716 = vmatprep.subr.bf16.mxu0 %v5056_v23  ;;  %v5125_v43 = vld [vmem:[#allocation5 + $0xeac] ss:$16 sps:$4 sm:$0xff]  }
 0x1c1   :  { %3757 = vmatprep.subr.bf16.mxu1 %v5059_v45  ;;  %v5120_v45 = vld [vmem:[#allocation5 + $0xca8] ss:$16 sps:$4 sm:$0xff]  }
 0x1c3   :  { %3717 = vmatpush1.bf16.msra.mxu0 %v5054_v46  ;;  %v5123_v46 = vld [vmem:[#allocation5 + $0xea8] ss:$16 sps:$4 sm:$0xff]  }
 0x1c4   :  { %3758 = vmatpush1.bf16.msra.mxu1 %v5057_v48  ;;  %3718 = vmatprep.subr.bf16.mxu0 %v5062_v49 }
 0x1c5   :  { %3759 = vmatprep.subr.bf16.mxu1 %v5065_v50  ;;  %v5128_v50 = vld [vmem:[#allocation5 + $0xc8c] ss:$16 sps:$4 sm:$0xff]  }
 0x1c7   :  { %3719 = vmatpush2.bf16.msra.mxu0 %v5060_v52  ;;  %v5131_v52 = vld [vmem:[#allocation5 + $0xe8c] ss:$16 sps:$4 sm:$0xff]  }
 0x1c8   :  { %3760 = vmatpush2.bf16.msra.mxu1 %v5063_v54  ;;  %3720 = vmatprep.subr.bf16.mxu0 %v5068_v55  ;;  %v5129_v54 = vld [vmem:[#allocation5 + $0xe88] ss:$16 sps:$4 sm:$0xff]   ;;  %v5137_v55 = vld [vmem:[#allocation5 + $0xe6c] ss:$16 sps:$4 sm:$0xff]  }
 0x1c9   :  { %3761 = vmatprep.subr.bf16.mxu1 %v5071_v56  ;;  %v5132_v56 = vld [vmem:[#allocation5 + $0xc68] ss:$16 sps:$4 sm:$0xff]  }
 0x1cb   :  { %3721 = vmatpush2.bf16.msra.mxu0 %v5066_v57  ;;  %v5135_v57 = vld [vmem:[#allocation5 + $0xe68] ss:$16 sps:$4 sm:$0xff]  }
 0x1cc   :  { %3762 = vmatpush2.bf16.msra.mxu1 %v5069_v59  ;;  %3722 = vmatprep.subr.bf16.mxu0 %v5074_v6  ;;  %v5140_v59 = vld [vmem:[#allocation5 + $0xc4c] ss:$16 sps:$4 sm:$0xff]  }
 0x1cd   :  { %3763 = vmatprep.subr.bf16.mxu1 %v5077_v7  ;;  %v5143_v6 = vld [vmem:[#allocation5 + $0xe4c] ss:$16 sps:$4 sm:$0xff]   ;;  %v5138_v7 = vld [vmem:[#allocation5 + $0xc48] ss:$16 sps:$4 sm:$0xff]  }
 0x1cf   :  { %3723 = vmatpush2.bf16.msra.mxu0 %v5072_v60  ;;  %v5141_v60 = vld [vmem:[#allocation5 + $0xe48] ss:$16 sps:$4 sm:$0xff]  }
 0x1d0   :  { %3764 = vmatpush2.bf16.msra.mxu1 %v5075_v61  ;;  %3724 = vmatprep.subr.bf16.mxu0 %v5080_v62  ;;  %v5146_v61 = vld [vmem:[#allocation5 + $0xc2c] ss:$16 sps:$4 sm:$0xff]  }
 0x1d1   :  { %3765 = vmatprep.subr.bf16.mxu1 %v5083_v1  ;;  %v5149_v62 = vld [vmem:[#allocation5 + $0xe2c] ss:$16 sps:$4 sm:$0xff]   ;;  %v5144_v1 = vld [vmem:[#allocation5 + $0xc28] ss:$16 sps:$4 sm:$0xff]  }
 0x1d3   :  { %3725 = vmatpush2.bf16.msra.mxu0 %v5078_v2  ;;  %v5147_v2 = vld [vmem:[#allocation5 + $0xe28] ss:$16 sps:$4 sm:$0xff]  }
 0x1d4   :  { %3766 = vmatpush2.bf16.msra.mxu1 %v5081_v3  ;;  %3726 = vmatprep.subr.bf16.mxu0 %v5086_v27  ;;  %v5152_v3 = vld [vmem:[#allocation5 + $0xc0c] ss:$16 sps:$4 sm:$0xff]  }
 0x1d5   :  { %3767 = vmatprep.subr.bf16.mxu1 %v5089_v36  ;;  %v5155_v27 = vld [vmem:[#allocation5 + $0xe0c] ss:$16 sps:$4 sm:$0xff]   ;;  %v5150_v36 = vld [vmem:[#allocation5 + $0xc08] ss:$16 sps:$4 sm:$0xff]  }
 0x1d7   :  { %3727 = vmatpush2.bf16.msra.mxu0 %v5084_v37  ;;  %v5153_v37 = vld [vmem:[#allocation5 + $0xe08] ss:$16 sps:$4 sm:$0xff]  }
 0x1d8   :  { %3768 = vmatpush2.bf16.msra.mxu1 %v5087_v4  ;;  %3728 = vmatprep.subr.bf16.mxu0 %v5092_v5  ;;  %v5158_v4 = vld [vmem:[#allocation5 + $0xdec] ss:$16 sps:$4 sm:$0xff]  }
 0x1d9   :  { %3769 = vmatprep.subr.bf16.mxu1 %v5095_v10  ;;  %v5161_v5 = vld [vmem:[#allocation5 + $0xfec] ss:$16 sps:$4 sm:$0xff]   ;;  %v5156_v10 = vld [vmem:[#allocation5 + $0xde8] ss:$16 sps:$4 sm:$0xff]  }
 0x1db   :  { %3729 = vmatpush2.bf16.msra.mxu0 %v5090_v35  ;;  %v5159_v35 = vld [vmem:[#allocation5 + $0xfe8] ss:$16 sps:$4 sm:$0xff]  }
 0x1dc   :  { %3770 = vmatpush2.bf16.msra.mxu1 %v5093_v12  ;;  %3730 = vmatprep.subr.bf16.mxu0 %v5098_v13  ;;  %v5164_v12 = vld [vmem:[#allocation5 + $0xdcc] ss:$16 sps:$4 sm:$0xff]  }
 0x1dd   :  { %3771 = vmatprep.subr.bf16.mxu1 %v5101_v14  ;;  %v5167_v13 = vld [vmem:[#allocation5 + $0xfcc] ss:$16 sps:$4 sm:$0xff]   ;;  %v5162_v14 = vld [vmem:[#allocation5 + $0xdc8] ss:$16 sps:$4 sm:$0xff]  }
 0x1df   :  { %3731 = vmatpush2.bf16.msra.mxu0 %v5096_v16  ;;  %v5165_v16 = vld [vmem:[#allocation5 + $0xfc8] ss:$16 sps:$4 sm:$0xff]  }
 0x1e0   :  { %3772 = vmatpush2.bf16.msra.mxu1 %v5099_v17  ;;  %3732 = vmatprep.subr.bf16.mxu0 %v5104_v15  ;;  %v5170_v17 = vld [vmem:[#allocation5 + $0xdac] ss:$16 sps:$4 sm:$0xff]  }
 0x1e1   :  { %3773 = vmatprep.subr.bf16.mxu1 %v5107_v19  ;;  %v5173_v15 = vld [vmem:[#allocation5 + $0xfac] ss:$16 sps:$4 sm:$0xff]   ;;  %v5168_v19 = vld [vmem:[#allocation5 + $0xda8] ss:$16 sps:$4 sm:$0xff]  }
 0x1e3   :  { %3733 = vmatpush2.bf16.msra.mxu0 %v5102_v20  ;;  %v5171_v20 = vld [vmem:[#allocation5 + $0xfa8] ss:$16 sps:$4 sm:$0xff]  }
 0x1e4   :  { %3774 = vmatpush2.bf16.msra.mxu1 %v5105_v21  ;;  %3784 = vmatprep.subr.bf16.mxu0 %v5110_v26  ;;  %v5176_v21 = vld [vmem:[#allocation5 + $0xd8c] ss:$16 sps:$4 sm:$0xff]  }
 0x1e5   :  { %3825 = vmatprep.subr.bf16.mxu1 %v5113_v28  ;;  %v5179_v26 = vld [vmem:[#allocation5 + $0xf8c] ss:$16 sps:$4 sm:$0xff]   ;;  %v5174_v28 = vld [vmem:[#allocation5 + $0xd88] ss:$16 sps:$4 sm:$0xff]  }
 0x1e6   :  { %v3490_v47 = vpop.f32.mrf.mxu0  ;;  %3735 = vmatmul.mubr.bf16.vlgmr.msra.gmra.mxu0 %v5380_v38 }
 0x1e7   :  { %v3531_v51 = vpop.f32.mrf.mxu1  ;;  %3776 = vmatmul.mubr.bf16.vlgmr.msra.gmra.mxu1 %v5384_v39  ;;  %v3491_v8 = vadd.f32 %v3490_v47, %v3450_v33  ;;  %3785 = vmatpush1.bf16.msra.mxu0 %v5108_v25  ;;  %v5185_v25 = vld [vmem:[#allocation5 + $0xf6c] ss:$16 sps:$4 sm:$0xff]   ;;  %v5186_v47 = vld [vmem:[#allocation5 + $0xd48] ss:$16 sps:$4 sm:$0xff]  }
 0x1e8   :  { %3826 = vmatpush1.bf16.msra.mxu1 %v5111_v30  ;;  %v3492_v34 = vpop.f32.mrf.mxu0  ;;  %3786 = vmatprep.subr.bf16.mxu0 %v5116_v31  ;;  %v5180_v30 = vld [vmem:[#allocation5 + $0xd68] ss:$16 sps:$4 sm:$0xff]   ;;  %v5191_v33 = vld [vmem:[#allocation5 + $0xf4c] ss:$16 sps:$4 sm:$0xff]  }
 0x1e9   :  { %v3533_v41 = vpop.f32.mrf.mxu1  ;;  %3827 = vmatprep.subr.bf16.mxu1 %v5119_v32  ;;  %v3532_v9 = vadd.f32 %v3531_v51, %v3491_v8  ;;  %v3493_v23 = vadd.f32 %v3492_v34, %v3452_v58  ;;  %3816 = vmatprep.mubr.bf16.mxu0 %v5390_v44  ;;  %v5126_v44 = vld [vmem:[#allocation5 + $0xc88] ss:$16 sps:$4 sm:$0xff]   ;;  %v5188_v32 = vld [vmem:[#allocation5 + $0xd4c] ss:$16 sps:$4 sm:$0xff]  }
 0x1ea   :  { %3857 = vmatprep.mubr.bf16.mxu1 %v5394_v22  ;;  %v3494_v38 = vpop.f32.mrf.mxu0  ;;  %v5134_v22 = vld [vmem:[#allocation5 + $0xc6c] ss:$16 sps:$4 sm:$0xff]   ;;  %v5183_v31 = vld [vmem:[#allocation5 + $0xf68] ss:$16 sps:$4 sm:$0xff]  }
 0x1eb   :  { %v3535_v39 = vpop.f32.mrf.mxu1  ;;  %3866 = vst [vmem:[#allocation8] sm:$0xff] %v3532_v9  ;;  %v3534_v40 = vadd.f32 %v3533_v41, %v3493_v23  ;;  %3787 = vmatpush1.bf16.msra.mxu0 %v5114_v18  ;;  %v5189_v51 = vld [vmem:[#allocation5 + $0xf48] ss:$16 sps:$4 sm:$0xff]   ;;  %v5194_v58 = vld [vmem:[#allocation5 + $0xd2c] ss:$16 sps:$4 sm:$0xff]   ;;  %v584_v9 = vsub.s32 2, %v5400_v53 }
 0x1ec   :  { %3828 = vmatpush1.bf16.msra.mxu1 %v5117_v11  ;;  %v3495_v48 = vpop.f32.mrf.mxu0  ;;  %3788 = vmatprep.subr.bf16.mxu0 %v5122_v42  ;;  %v5197_v8 = vld [vmem:[#allocation5 + $0xf2c] ss:$16 sps:$4 sm:$0xff]   ;;  %v5192_v18 = vld [vmem:[#allocation5 + $0xd28] ss:$16 sps:$4 sm:$0xff]   ;;  %v588_v23 = vsub.s32 3, %v5400_v53 }
 0x1ed   :  { %v3536_v49 = vpop.f32.mrf.mxu1  ;;  %3829 = vmatprep.subr.bf16.mxu1 %v5125_v43  ;;  %3867 = vst [vmem:[#allocation8 + $0x8] sm:$0xff] %v3534_v40  ;;  %v5195_v11 = vld [vmem:[#allocation5 + $0xf28] ss:$16 sps:$4 sm:$0xff]   ;;  %v5200_v34 = vld [vmem:[#allocation5 + $0xd0c] ss:$16 sps:$4 sm:$0xff]  }
 0x1ee   :  { %v5203_v41 = vld [vmem:[#allocation5 + $0xf0c] ss:$16 sps:$4 sm:$0xff]   ;;  %v5198_v42 = vld [vmem:[#allocation5 + $0xd08] ss:$16 sps:$4 sm:$0xff]   ;;  %v5204_v38 = vld [vmem:[#allocation7] sm:$0xf] }
 0x1ef   :  { %3789 = vmatpush1.bf16.msra.mxu0 %v5120_v45  ;;  %v5201_v43 = vld [vmem:[#allocation5 + $0xf08] ss:$16 sps:$4 sm:$0xff]   ;;  %v585_v39 = vrot.slane %v5204_v38, %v584_v9  ;;  %v589_v40 = vrot.slane %v5204_v38, %v588_v23 }
 0x1f0   :  { %3830 = vmatpush1.bf16.msra.mxu1 %v5123_v46  ;;  %3790 = vmatprep.subr.bf16.mxu0 %v5128_v50 }
 0x1f1   :  { %3831 = vmatprep.subr.bf16.mxu1 %v5131_v52 }
 0x1f3   :  { %3791 = vmatpush1.bf16.msra.mxu0 %v5126_v44 }
 0x1f4   :  { %3832 = vmatpush1.bf16.msra.mxu1 %v5129_v54  ;;  %3792 = vmatprep.subr.bf16.mxu0 %v5134_v22 }
 0x1f5   :  { %3833 = vmatprep.subr.bf16.mxu1 %v5137_v55 }
 0x1f7   :  { %3793 = vmatpush1.bf16.msra.mxu0 %v5132_v56 }
 0x1f8   :  { %3834 = vmatpush1.bf16.msra.mxu1 %v5135_v57  ;;  %3794 = vmatprep.subr.bf16.mxu0 %v5140_v59 }
 0x1f9   :  { %3835 = vmatprep.subr.bf16.mxu1 %v5143_v6 }
 0x1fb   :  { %3795 = vmatpush1.bf16.msra.mxu0 %v5138_v7 }
 0x1fc   :  { %3836 = vmatpush1.bf16.msra.mxu1 %v5141_v60  ;;  %3796 = vmatprep.subr.bf16.mxu0 %v5146_v61 }
 0x1fd   :  { %3837 = vmatprep.subr.bf16.mxu1 %v5149_v62 }
 0x1ff   :  { %3797 = vmatpush1.bf16.msra.mxu0 %v5144_v1 }
 0x200   :  { %3838 = vmatpush1.bf16.msra.mxu1 %v5147_v2  ;;  %3798 = vmatprep.subr.bf16.mxu0 %v5152_v3 }
 0x201   :  { %3839 = vmatprep.subr.bf16.mxu1 %v5155_v27 }
 0x203   :  { %3799 = vmatpush1.bf16.msra.mxu0 %v5150_v36 }
 0x204   :  { %3840 = vmatpush1.bf16.msra.mxu1 %v5153_v37  ;;  %3800 = vmatprep.subr.bf16.mxu0 %v5158_v4 }
 0x205   :  { %3841 = vmatprep.subr.bf16.mxu1 %v5161_v5 }
 0x207   :  { %3801 = vmatpush2.bf16.msra.mxu0 %v5156_v10 }
 0x208   :  { %3842 = vmatpush2.bf16.msra.mxu1 %v5159_v35  ;;  %3802 = vmatprep.subr.bf16.mxu0 %v5164_v12 }
 0x209   :  { %3843 = vmatprep.subr.bf16.mxu1 %v5167_v13 }
 0x20b   :  { %3803 = vmatpush2.bf16.msra.mxu0 %v5162_v14 }
 0x20c   :  { %3844 = vmatpush2.bf16.msra.mxu1 %v5165_v16  ;;  %3804 = vmatprep.subr.bf16.mxu0 %v5170_v17 }
 0x20d   :  { %3845 = vmatprep.subr.bf16.mxu1 %v5173_v15 }
 0x20f   :  { %3805 = vmatpush2.bf16.msra.mxu0 %v5168_v19 }
 0x210   :  { %3846 = vmatpush2.bf16.msra.mxu1 %v5171_v20  ;;  %3806 = vmatprep.subr.bf16.mxu0 %v5176_v21 }
 0x211   :  { %3847 = vmatprep.subr.bf16.mxu1 %v5179_v26 }
 0x213   :  { %3807 = vmatpush2.bf16.msra.mxu0 %v5174_v28 }
 0x214   :  { %3848 = vmatpush2.bf16.msra.mxu1 %v5177_v29  ;;  %3808 = vmatprep.subr.bf16.mxu0 %v5182_v24 }
 0x215   :  { %3849 = vmatprep.subr.bf16.mxu1 %v5185_v25 }
 0x217   :  { %3809 = vmatpush2.bf16.msra.mxu0 %v5180_v30 }
 0x218   :  { %3850 = vmatpush2.bf16.msra.mxu1 %v5183_v31  ;;  %3810 = vmatprep.subr.bf16.mxu0 %v5188_v32 }
 0x219   :  { %3851 = vmatprep.subr.bf16.mxu1 %v5191_v33 }
 0x21b   :  { %3811 = vmatpush2.bf16.msra.mxu0 %v5186_v47 }
 0x21c   :  { %3852 = vmatpush2.bf16.msra.mxu1 %v5189_v51  ;;  %3812 = vmatprep.subr.bf16.mxu0 %v5194_v58 }
 0x21d   :  { %3853 = vmatprep.subr.bf16.mxu1 %v5197_v8 }
 0x21f   :  { %3813 = vmatpush2.bf16.msra.mxu0 %v5192_v18 }
 0x220   :  { %3854 = vmatpush2.bf16.msra.mxu1 %v5195_v11  ;;  %3814 = vmatprep.subr.bf16.mxu0 %v5200_v34 }
 0x221   :  { %3855 = vmatprep.subr.bf16.mxu1 %v5203_v41 }
 0x223   :  { %3815 = vmatpush2.bf16.msra.mxu0 %v5198_v42 }
 0x224   :  { %3856 = vmatpush2.bf16.msra.mxu1 %v5201_v43 }
 0x226   :  { %v3572_v45 = vpop.f32.mrf.mxu0  ;;  %3817 = vmatmul.mubr.bf16.vlgmr.msra.gmra.mxu0 %v5406_v63 }
 0x227   :  { %v3613_v46 = vpop.f32.mrf.mxu1  ;;  %3858 = vmatmul.mubr.bf16.vlgmr.msra.gmra.mxu1 %v5410_v0  ;;  %v3573_v48 = vadd.f32 %v3572_v45, %v585_v39 }
 0x228   :  { %v3574_v49 = vpop.f32.mrf.mxu0 }
 0x229   :  { %v3615_v50 = vpop.f32.mrf.mxu1  ;;  %v3614_v52 = vadd.f32 %v3613_v46, %v3573_v48  ;;  %v3575_v44 = vadd.f32 %v3574_v49, %v589_v40 }
 0x22a   :  { %v3576_v54 = vpop.f32.mrf.mxu0 }
 0x22b   :  { %v3617_v22 = vpop.f32.mrf.mxu1  ;;  %v3616_v55 = vadd.f32 %v3615_v50, %v3575_v44 }
 0x22c   :  { %v3577_v53 = vpop.f32.mrf.mxu0 }
 0x22d   :  { %v3618_v56 = vpop.f32.mrf.mxu1 }
 0x266   :  { %v3654_v57 = vpop.f32.mrf.mxu0 }
 0x267   :  { %v3695_v59 = vpop.f32.mrf.mxu1  ;;  %v3655_v6 = vadd.f32 %v3654_v57, %v3614_v52 }
 0x268   :  { %v3656_v7 = vpop.f32.mrf.mxu0 }
 0x269   :  { %v3697_v60 = vpop.f32.mrf.mxu1  ;;  %v3696_v61 = vadd.f32 %v3695_v59, %v3655_v6  ;;  %v3657_v62 = vadd.f32 %v3656_v7, %v3616_v55 }
 0x26a   :  { %v3658_v63 = vpop.f32.mrf.mxu0 }
 0x26b   :  { %v3699_v1 = vpop.f32.mrf.mxu1  ;;  %v3698_v0 = vadd.f32 %v3697_v60, %v3657_v62 }
 0x26c   :  { %v3659_v2 = vpop.f32.mrf.mxu0 }
 0x26d   :  { %v3700_v3 = vpop.f32.mrf.mxu1 }
 0x2a6   :  { %v3736_v27 = vpop.f32.mrf.mxu0 }
 0x2a7   :  { %v3777_v36 = vpop.f32.mrf.mxu1  ;;  %v3737_v13 = vadd.f32 %v3736_v27, %v3696_v61 }
 0x2a8   :  { %v3738_v37 = vpop.f32.mrf.mxu0 }
 0x2a9   :  { %v3779_v4 = vpop.f32.mrf.mxu1  ;;  %v3739_v14 = vadd.f32 %v3738_v37, %v3698_v0  ;;  %v3778_v16 = vadd.f32 %v3777_v36, %v3737_v13 }
 0x2aa   :  { %v3740_v5 = vpop.f32.mrf.mxu0 }
 0x2ab   :  { %v3781_v10 = vpop.f32.mrf.mxu1  ;;  %v3780_v19 = vadd.f32 %v3779_v4, %v3739_v14 }
 0x2ac   :  { %v3741_v35 = vpop.f32.mrf.mxu0 }
 0x2ad   :  { %v3782_v12 = vpop.f32.mrf.mxu1 }
 0x2e6   :  { %v3818_v17 = vpop.f32.mrf.mxu0 }
 0x2e7   :  { %v3859_v15 = vpop.f32.mrf.mxu1  ;;  %v3819_v20 = vadd.f32 %v3818_v17, %v3778_v16 }
 0x2e8   :  { %v3820_v21 = vpop.f32.mrf.mxu0 }
 0x2e9   :  { %v3861_v26 = vpop.f32.mrf.mxu1  ;;  %v3860_v28 = vadd.f32 %v3859_v15, %v3819_v20  ;;  %v3821_v29 = vadd.f32 %v3820_v21, %v3780_v19 }
 0x2ea   :  { %v3822_v24 = vpop.f32.mrf.mxu0 }
 0x2eb   :  { %v3863_v25 = vpop.f32.mrf.mxu1  ;;  %3868 = vst [vmem:[#allocation8 + $0x10] sm:$0xff] %v3860_v28  ;;  %v3862_v30 = vadd.f32 %v3861_v26, %v3821_v29 }
 0x2ec   :  { %v3823_v31 = vpop.f32.mrf.mxu0 }
 0x2ed   :  { %v3864_v32 = vpop.f32.mrf.mxu1  ;;  %3869 = vst [vmem:[#allocation8 + $0x18] sm:$0xff] %v3862_v30 }
 0x2ee   :  { %5276 = shalt.err (!%p5273_p5)
}
 0x2ef   :  { %3879 = dma.vmem_to_hbm [thread:$0]  %s3877_s2, 512, %s5462_s3, [#allocation4]  }
 0x2f0   :  { %5289 = dma.done.wait [#allocation4], 512  }
 0x2f1   :  { %5290 = vsyncadd [#allocation4], 4294966784 }
 0x2f2   :  { %3883 = vsyncpa [#allocation3], 1 }
 0x2f3   :  { %3884 = vsyncpa [#allocation6], 1 }
 0x2f4   :  { %3885 = vsyncpa [#allocation4], 1 }

</bundles_post_ra>
